<compile_context>
chip_gen: v5e
topology: v5e:2x2
jax: 0.10.0
libtpu: 0.0.40
codegen_flags: <defaults>
</compile_context>

<pallas_src>
import jax
import jax.numpy as jnp
from jax import lax
from jax.experimental import pallas as pl
from jax.experimental.pallas import tpu as pltpu

# ----------------------------- model dims (small) -----------------------------
B = 2          # batch
BP = 8         # batch padded to one full sublane group
T = 8          # sequence length
F_IN = 40      # input_size (mfcc features)
E = 64         # embedding size (nn.Linear(input_size, 64))
H = 32         # hidden_size (scaled down from 256)
NUM_LAYERS = 2
OUT = 28       # output_size
OUT_PAD = 128  # lane-dense output width


# ------------------------------- fused kernel ---------------------------------
def _fused_lstm_asr_kernel(x_ref, emb_w_ref, emb_b_ref,
                           w_ih0_ref, w_hh0_ref, b0_ref,
                           w_cat1_ref, b1_ref,
                           fc_w_ref, fc_b_ref,
                           out_ref, h1_seq):
    # x_ref: (T*BP, F_IN), time-major rows r = t*BP + b; rows b >= B are zero.
    x = x_ref[...]

    # Embedding + hoisted layer-0 input projection: two big off-critical-path matmuls.
    emb = jnp.dot(x, emb_w_ref[...], preferred_element_type=jnp.float32) + emb_b_ref[...]
    gx0 = jnp.dot(emb, w_ih0_ref[...], preferred_element_type=jnp.float32) + b0_ref[...]  # (T*BP, 4H)

    w_hh0 = w_hh0_ref[...]        # (H, 4H)
    w_cat1 = w_cat1_ref[...]      # (2H, 4H) = [W_hh1; W_ih1]
    b1 = b1_ref[...]              # (1, 4H)

    h0 = jnp.zeros((BP, H), jnp.float32)
    c0 = jnp.zeros((BP, H), jnp.float32)
    h1 = jnp.zeros((BP, H), jnp.float32)
    c1 = jnp.zeros((BP, H), jnp.float32)

    def gate_update(gates, c):
        # Full-width EUP passes over the whole (BP, 4H) gate tile, then lane-slice
        # the results.  Gate order (i, f, g, o) matches PyTorch.
        sg = jax.nn.sigmoid(gates)
        tg = jnp.tanh(gates)
        i = sg[:, 0 * H:1 * H]
        f = sg[:, 1 * H:2 * H]
        g = tg[:, 2 * H:3 * H]
        o = sg[:, 3 * H:4 * H]
        c_new = f * c + i * g
        h_new = o * jnp.tanh(c_new)
        return h_new, c_new

    # Both layer recurrences in one fully-unrolled loop: layer-1 step t only needs
    # layer-0's h_t, so layer-0 step t+1 can be scheduled alongside layer-1 step t.
    for t in range(T):
        # ---- layer 0, step t: only h0 @ W_hh0 is on the serial path ----
        gates0 = gx0[t * BP:(t + 1) * BP, :] + jnp.dot(
            h0, w_hh0, preferred_element_type=jnp.float32)
        h0, c0 = gate_update(gates0, c0)

        # ---- layer 1, step t: fused input+recurrent projection (one MXU push) ----
        gates1 = jnp.dot(jnp.concatenate([h1, h0], axis=1), w_cat1,
                         preferred_element_type=jnp.float32) + b1
        h1, c1 = gate_update(gates1, c1)

        # Aligned full-sublane store into VMEM scratch (off the critical path).
        h1_seq[t * BP:(t + 1) * BP, :] = h1

    # Final fc: one big (T*BP, H) @ (H, 128) matmul and a single lane-dense store.
    out_ref[...] = (jnp.dot(h1_seq[...], fc_w_ref[...],
                            preferred_element_type=jnp.float32)
                    + fc_b_ref[...]).astype(out_ref.dtype)


# ------------------------------ forward wrapper -------------------------------
@jax.jit
def lstm_asr_forward(batch_features, params):
    """batch_features: (B, T, F_IN) float32 -> logits (B, T, OUT)."""
    b, t, f = batch_features.shape

    # Time-major, sublane-padded input: (T, BP, F) -> (T*BP, F).
    x_tm = jnp.transpose(batch_features, (1, 0, 2))
    x_tm = jnp.pad(x_tm, ((0, 0), (0, BP - b), (0, 0)))
    x2d = x_tm.reshape(t * BP, f)

    # Layer-1 fused weight [W_hh1; W_ih1] (K = 2H) and lane-dense fc weights.
    w_cat1 = jnp.concatenate([params["w_hh_1"], params["w_ih_1"]], axis=0)
    fc_w_pad = jnp.pad(params["fc_w"], ((0, 0), (0, OUT_PAD - OUT)))
    fc_b_pad = jnp.pad(params["fc_b"], (0, OUT_PAD - OUT)).reshape(1, OUT_PAD)

    out2d = pl.pallas_call(
        _fused_lstm_asr_kernel,
        out_shape=jax.ShapeDtypeStruct((t * BP, OUT_PAD), jnp.float32),
        scratch_shapes=[pltpu.VMEM((t * BP, H), jnp.float32)],
        # grid-less call: every operand is mapped whole into VMEM once.
    )(x2d,
      params["emb_w"], params["emb_b"].reshape(1, E),
      params["w_ih_0"], params["w_hh_0"], params["b_0"].reshape(1, 4 * H),
      w_cat1, params["b_1"].reshape(1, 4 * H),
      fc_w_pad, fc_b_pad)

    # Strip batch padding / output-lane padding; back to batch-first.
    out = out2d.reshape(t, BP, OUT_PAD)[:, :b, :OUT]
    return jnp.transpose(out, (1, 0, 2))


# --------------------------- pure-JAX reference --------------------------------
def lstm_asr_reference(batch_features, params):
    emb = batch_features @ params["emb_w"] + params["emb_b"]
    h_seq = emb
    for l in range(NUM_LAYERS):
        w_ih = params[f"w_ih_{l}"]
        w_hh = params[f"w_hh_{l}"]
        bias = params[f"b_{l}"]
        hid = w_hh.shape[0]

        def step(carry, x_t):
            h, c = carry
            gates = x_t @ w_ih + h @ w_hh + bias
            i = jax.nn.sigmoid(gates[:, 0 * hid:1 * hid])
            f = jax.nn.sigmoid(gates[:, 1 * hid:2 * hid])
            g = jnp.tanh(gates[:, 2 * hid:3 * hid])
            o = jax.nn.sigmoid(gates[:, 3 * hid:4 * hid])
            c = f * c + i * g
            h = o * jnp.tanh(c)
            return (h, c), h

        init = (jnp.zeros((h_seq.shape[0], hid), jnp.float32),
                jnp.zeros((h_seq.shape[0], hid), jnp.float32))
        _, hs = lax.scan(step, init, jnp.transpose(h_seq, (1, 0, 2)))
        h_seq = jnp.transpose(hs, (1, 0, 2))
    return h_seq @ params["fc_w"] + params["fc_b"]


# --------------------------------- params --------------------------------------
def init_params(key):
    ks = jax.random.split(key, 3 + 3 * NUM_LAYERS)
    params = {
        "emb_w": 0.1 * jax.random.normal(ks[0], (F_IN, E), jnp.float32),
        "emb_b": 0.1 * jax.random.normal(ks[1], (E,), jnp.float32),
        "fc_w": 0.1 * jax.random.normal(ks[2], (H, OUT), jnp.float32),
        "fc_b": jnp.zeros((OUT,), jnp.float32),
    }
    for l in range(NUM_LAYERS):
        d_in = E if l == 0 else H
        params[f"w_ih_{l}"] = 0.1 * jax.random.normal(ks[3 + 3 * l], (d_in, 4 * H), jnp.float32)
        params[f"w_hh_{l}"] = 0.1 * jax.random.normal(ks[4 + 3 * l], (H, 4 * H), jnp.float32)
        # combined b_ih + b_hh
        params[f"b_{l}"] = 0.1 * jax.random.normal(ks[5 + 3 * l], (4 * H,), jnp.float32)
    return params


if __name__ == "__main__":
    key = jax.random.PRNGKey(0)
    pkey, xkey = jax.random.split(key)
    params = init_params(pkey)
    batch_features = jax.random.normal(xkey, (B, T, F_IN), jnp.float32)

    out = lstm_asr_forward(batch_features, params)
    out = jax.block_until_ready(out)
    assert out.shape == (B, T, OUT), out.shape

    ref = lstm_asr_reference(batch_features, params)
    ref = jax.block_until_ready(ref)
    assert jnp.allclose(out, ref, atol=2e-3, rtol=2e-3), float(jnp.max(jnp.abs(out - ref)))

    print("KERNEL_OK")
</pallas_src>

<mosaic_0001>
module attributes {stable_mosaic.version = 11 : i64} {
  func.func @_fused_lstm_asr_kernel(%arg0: memref<64x40xf32, #tpu.memory_space<vmem>>, %arg1: memref<40x64xf32, #tpu.memory_space<vmem>>, %arg2: memref<1x64xf32, #tpu.memory_space<vmem>>, %arg3: memref<64x128xf32, #tpu.memory_space<vmem>>, %arg4: memref<32x128xf32, #tpu.memory_space<vmem>>, %arg5: memref<1x128xf32, #tpu.memory_space<vmem>>, %arg6: memref<64x128xf32, #tpu.memory_space<vmem>>, %arg7: memref<1x128xf32, #tpu.memory_space<vmem>>, %arg8: memref<32x128xf32, #tpu.memory_space<vmem>>, %arg9: memref<1x128xf32, #tpu.memory_space<vmem>>, %arg10: memref<64x128xf32, #tpu.memory_space<vmem>>, %arg11: memref<64x32xf32, #tpu.memory_space<vmem>>) attributes {dimension_semantics = [], scalar_prefetch = 0 : i64, scratch_operands = 1 : i64, tpu.core_type = #tpu.core_type<tc>} {
    %c0 = arith.constant 0 : index
    %c0_0 = arith.constant 0 : index
    %0 = vector.load %arg0[%c0, %c0_0] : memref<64x40xf32, #tpu.memory_space<vmem>>, vector<64x40xf32>
    %c0_1 = arith.constant 0 : index
    %c0_2 = arith.constant 0 : index
    %1 = vector.load %arg1[%c0_1, %c0_2] : memref<40x64xf32, #tpu.memory_space<vmem>>, vector<40x64xf32>
    %cst = arith.constant dense<0.000000e+00> : vector<64x64xf32>
    %2 = tpu.matmul %0, %1, %cst {dimension_numbers = #tpu.dot_dimension_numbers<[1], [0], [0], [1], [0, 0, 1, 1], [], []>} : vector<64x40xf32>, vector<40x64xf32>, vector<64x64xf32> -> vector<64x64xf32>
    %c0_3 = arith.constant 0 : index
    %c0_4 = arith.constant 0 : index
    %3 = vector.load %arg2[%c0_3, %c0_4] : memref<1x64xf32, #tpu.memory_space<vmem>>, vector<1x64xf32>
    %4 = vector.broadcast %3 : vector<1x64xf32> to vector<64x64xf32>
    %5 = arith.addf %2, %4 : vector<64x64xf32>
    %c0_5 = arith.constant 0 : index
    %c0_6 = arith.constant 0 : index
    %6 = vector.load %arg3[%c0_5, %c0_6] : memref<64x128xf32, #tpu.memory_space<vmem>>, vector<64x128xf32>
    %cst_7 = arith.constant dense<0.000000e+00> : vector<64x128xf32>
    %7 = tpu.matmul %5, %6, %cst_7 {dimension_numbers = #tpu.dot_dimension_numbers<[1], [0], [0], [1], [0, 0, 1, 1], [], []>} : vector<64x64xf32>, vector<64x128xf32>, vector<64x128xf32> -> vector<64x128xf32>
    %c0_8 = arith.constant 0 : index
    %c0_9 = arith.constant 0 : index
    %8 = vector.load %arg5[%c0_8, %c0_9] : memref<1x128xf32, #tpu.memory_space<vmem>>, vector<1x128xf32>
    %9 = vector.broadcast %8 : vector<1x128xf32> to vector<64x128xf32>
    %10 = arith.addf %7, %9 : vector<64x128xf32>
    %c0_10 = arith.constant 0 : index
    %c0_11 = arith.constant 0 : index
    %11 = vector.load %arg4[%c0_10, %c0_11] : memref<32x128xf32, #tpu.memory_space<vmem>>, vector<32x128xf32>
    %c0_12 = arith.constant 0 : index
    %c0_13 = arith.constant 0 : index
    %12 = vector.load %arg6[%c0_12, %c0_13] : memref<64x128xf32, #tpu.memory_space<vmem>>, vector<64x128xf32>
    %c0_14 = arith.constant 0 : index
    %c0_15 = arith.constant 0 : index
    %13 = vector.load %arg7[%c0_14, %c0_15] : memref<1x128xf32, #tpu.memory_space<vmem>>, vector<1x128xf32>
    %cst_16 = arith.constant 0.000000e+00 : f32
    %14 = vector.broadcast %cst_16 : f32 to vector<8x32xf32>
    %cst_17 = arith.constant 0.000000e+00 : f32
    %15 = vector.broadcast %cst_17 : f32 to vector<8x32xf32>
    %cst_18 = arith.constant 0.000000e+00 : f32
    %16 = vector.broadcast %cst_18 : f32 to vector<8x32xf32>
    %cst_19 = arith.constant 0.000000e+00 : f32
    %17 = vector.broadcast %cst_19 : f32 to vector<8x32xf32>
    %18 = vector.extract_strided_slice %10 {offsets = [0, 0], sizes = [8, 128], strides = [1, 1]} : vector<64x128xf32> to vector<8x128xf32>
    %cst_20 = arith.constant dense<0.000000e+00> : vector<8x128xf32>
    %19 = tpu.matmul %14, %11, %cst_20 {dimension_numbers = #tpu.dot_dimension_numbers<[1], [0], [0], [1], [0, 0, 1, 1], [], []>} : vector<8x32xf32>, vector<32x128xf32>, vector<8x128xf32> -> vector<8x128xf32>
    %20 = arith.addf %18, %19 : vector<8x128xf32>
    %21 = arith.negf %20 : vector<8x128xf32>
    %22 = math.exp %21 : vector<8x128xf32>
    %cst_21 = arith.constant 1.000000e+00 : f32
    %23 = vector.broadcast %cst_21 : f32 to vector<8x128xf32>
    %24 = arith.addf %23, %22 : vector<8x128xf32>
    %25 = arith.divf %23, %24 : vector<8x128xf32>
    %26 = math.tanh %20 : vector<8x128xf32>
    %27 = vector.extract_strided_slice %25 {offsets = [0, 0], sizes = [8, 32], strides = [1, 1]} : vector<8x128xf32> to vector<8x32xf32>
    %28 = vector.extract_strided_slice %25 {offsets = [0, 32], sizes = [8, 32], strides = [1, 1]} : vector<8x128xf32> to vector<8x32xf32>
    %29 = vector.extract_strided_slice %26 {offsets = [0, 64], sizes = [8, 32], strides = [1, 1]} : vector<8x128xf32> to vector<8x32xf32>
    %30 = vector.extract_strided_slice %25 {offsets = [0, 96], sizes = [8, 32], strides = [1, 1]} : vector<8x128xf32> to vector<8x32xf32>
    %31 = arith.mulf %28, %15 : vector<8x32xf32>
    %32 = arith.mulf %27, %29 : vector<8x32xf32>
    %33 = arith.addf %31, %32 : vector<8x32xf32>
    %34 = math.tanh %33 : vector<8x32xf32>
    %35 = arith.mulf %30, %34 : vector<8x32xf32>
    %36 = tpu.concatenate %16, %35 in 1 : vector<8x32xf32>, vector<8x32xf32> -> vector<8x64xf32>
    %cst_22 = arith.constant dense<0.000000e+00> : vector<8x128xf32>
    %37 = tpu.matmul %36, %12, %cst_22 {dimension_numbers = #tpu.dot_dimension_numbers<[1], [0], [0], [1], [0, 0, 1, 1], [], []>} : vector<8x64xf32>, vector<64x128xf32>, vector<8x128xf32> -> vector<8x128xf32>
    %38 = vector.broadcast %13 : vector<1x128xf32> to vector<8x128xf32>
    %39 = arith.addf %37, %38 : vector<8x128xf32>
    %40 = arith.negf %39 : vector<8x128xf32>
    %41 = math.exp %40 : vector<8x128xf32>
    %cst_23 = arith.constant 1.000000e+00 : f32
    %42 = vector.broadcast %cst_23 : f32 to vector<8x128xf32>
    %43 = arith.addf %42, %41 : vector<8x128xf32>
    %44 = arith.divf %42, %43 : vector<8x128xf32>
    %45 = math.tanh %39 : vector<8x128xf32>
    %46 = vector.extract_strided_slice %44 {offsets = [0, 0], sizes = [8, 32], strides = [1, 1]} : vector<8x128xf32> to vector<8x32xf32>
    %47 = vector.extract_strided_slice %44 {offsets = [0, 32], sizes = [8, 32], strides = [1, 1]} : vector<8x128xf32> to vector<8x32xf32>
    %48 = vector.extract_strided_slice %45 {offsets = [0, 64], sizes = [8, 32], strides = [1, 1]} : vector<8x128xf32> to vector<8x32xf32>
    %49 = vector.extract_strided_slice %44 {offsets = [0, 96], sizes = [8, 32], strides = [1, 1]} : vector<8x128xf32> to vector<8x32xf32>
    %50 = arith.mulf %47, %17 : vector<8x32xf32>
    %51 = arith.mulf %46, %48 : vector<8x32xf32>
    %52 = arith.addf %50, %51 : vector<8x32xf32>
    %53 = math.tanh %52 : vector<8x32xf32>
    %54 = arith.mulf %49, %53 : vector<8x32xf32>
    %c0_24 = arith.constant 0 : index
    %c0_25 = arith.constant 0 : index
    %55 = vector.load %arg11[%c0_24, %c0_25] : memref<64x32xf32, #tpu.memory_space<vmem>>, vector<8x32xf32>
    tpu.vector_store %arg11[%c0_24, %c0_25], %54 {strides = array<i32>} : memref<64x32xf32, #tpu.memory_space<vmem>>, vector<8x32xf32>,
    %56 = vector.extract_strided_slice %10 {offsets = [8, 0], sizes = [8, 128], strides = [1, 1]} : vector<64x128xf32> to vector<8x128xf32>
    %cst_26 = arith.constant dense<0.000000e+00> : vector<8x128xf32>
    %57 = tpu.matmul %35, %11, %cst_26 {dimension_numbers = #tpu.dot_dimension_numbers<[1], [0], [0], [1], [0, 0, 1, 1], [], []>} : vector<8x32xf32>, vector<32x128xf32>, vector<8x128xf32> -> vector<8x128xf32>
    %58 = arith.addf %56, %57 : vector<8x128xf32>
    %59 = arith.negf %58 : vector<8x128xf32>
    %60 = math.exp %59 : vector<8x128xf32>
    %cst_27 = arith.constant 1.000000e+00 : f32
    %61 = vector.broadcast %cst_27 : f32 to vector<8x128xf32>
    %62 = arith.addf %61, %60 : vector<8x128xf32>
    %63 = arith.divf %61, %62 : vector<8x128xf32>
    %64 = math.tanh %58 : vector<8x128xf32>
    %65 = vector.extract_strided_slice %63 {offsets = [0, 0], sizes = [8, 32], strides = [1, 1]} : vector<8x128xf32> to vector<8x32xf32>
    %66 = vector.extract_strided_slice %63 {offsets = [0, 32], sizes = [8, 32], strides = [1, 1]} : vector<8x128xf32> to vector<8x32xf32>
    %67 = vector.extract_strided_slice %64 {offsets = [0, 64], sizes = [8, 32], strides = [1, 1]} : vector<8x128xf32> to vector<8x32xf32>
    %68 = vector.extract_strided_slice %63 {offsets = [0, 96], sizes = [8, 32], strides = [1, 1]} : vector<8x128xf32> to vector<8x32xf32>
    %69 = arith.mulf %66, %33 : vector<8x32xf32>
    %70 = arith.mulf %65, %67 : vector<8x32xf32>
    %71 = arith.addf %69, %70 : vector<8x32xf32>
    %72 = math.tanh %71 : vector<8x32xf32>
    %73 = arith.mulf %68, %72 : vector<8x32xf32>
    %74 = tpu.concatenate %54, %73 in 1 : vector<8x32xf32>, vector<8x32xf32> -> vector<8x64xf32>
    %cst_28 = arith.constant dense<0.000000e+00> : vector<8x128xf32>
    %75 = tpu.matmul %74, %12, %cst_28 {dimension_numbers = #tpu.dot_dimension_numbers<[1], [0], [0], [1], [0, 0, 1, 1], [], []>} : vector<8x64xf32>, vector<64x128xf32>, vector<8x128xf32> -> vector<8x128xf32>
    %76 = vector.broadcast %13 : vector<1x128xf32> to vector<8x128xf32>
    %77 = arith.addf %75, %76 : vector<8x128xf32>
    %78 = arith.negf %77 : vector<8x128xf32>
    %79 = math.exp %78 : vector<8x128xf32>
    %cst_29 = arith.constant 1.000000e+00 : f32
    %80 = vector.broadcast %cst_29 : f32 to vector<8x128xf32>
    %81 = arith.addf %80, %79 : vector<8x128xf32>
    %82 = arith.divf %80, %81 : vector<8x128xf32>
    %83 = math.tanh %77 : vector<8x128xf32>
    %84 = vector.extract_strided_slice %82 {offsets = [0, 0], sizes = [8, 32], strides = [1, 1]} : vector<8x128xf32> to vector<8x32xf32>
    %85 = vector.extract_strided_slice %82 {offsets = [0, 32], sizes = [8, 32], strides = [1, 1]} : vector<8x128xf32> to vector<8x32xf32>
    %86 = vector.extract_strided_slice %83 {offsets = [0, 64], sizes = [8, 32], strides = [1, 1]} : vector<8x128xf32> to vector<8x32xf32>
    %87 = vector.extract_strided_slice %82 {offsets = [0, 96], sizes = [8, 32], strides = [1, 1]} : vector<8x128xf32> to vector<8x32xf32>
    %88 = arith.mulf %85, %52 : vector<8x32xf32>
    %89 = arith.mulf %84, %86 : vector<8x32xf32>
    %90 = arith.addf %88, %89 : vector<8x32xf32>
    %91 = math.tanh %90 : vector<8x32xf32>
    %92 = arith.mulf %87, %91 : vector<8x32xf32>
    %c8 = arith.constant 8 : index
    %c0_30 = arith.constant 0 : index
    %93 = vector.load %arg11[%c8, %c0_30] : memref<64x32xf32, #tpu.memory_space<vmem>>, vector<8x32xf32>
    tpu.vector_store %arg11[%c8, %c0_30], %92 {strides = array<i32>} : memref<64x32xf32, #tpu.memory_space<vmem>>, vector<8x32xf32>,
    %94 = vector.extract_strided_slice %10 {offsets = [16, 0], sizes = [8, 128], strides = [1, 1]} : vector<64x128xf32> to vector<8x128xf32>
    %cst_31 = arith.constant dense<0.000000e+00> : vector<8x128xf32>
    %95 = tpu.matmul %73, %11, %cst_31 {dimension_numbers = #tpu.dot_dimension_numbers<[1], [0], [0], [1], [0, 0, 1, 1], [], []>} : vector<8x32xf32>, vector<32x128xf32>, vector<8x128xf32> -> vector<8x128xf32>
    %96 = arith.addf %94, %95 : vector<8x128xf32>
    %97 = arith.negf %96 : vector<8x128xf32>
    %98 = math.exp %97 : vector<8x128xf32>
    %cst_32 = arith.constant 1.000000e+00 : f32
    %99 = vector.broadcast %cst_32 : f32 to vector<8x128xf32>
    %100 = arith.addf %99, %98 : vector<8x128xf32>
    %101 = arith.divf %99, %100 : vector<8x128xf32>
    %102 = math.tanh %96 : vector<8x128xf32>
    %103 = vector.extract_strided_slice %101 {offsets = [0, 0], sizes = [8, 32], strides = [1, 1]} : vector<8x128xf32> to vector<8x32xf32>
    %104 = vector.extract_strided_slice %101 {offsets = [0, 32], sizes = [8, 32], strides = [1, 1]} : vector<8x128xf32> to vector<8x32xf32>
    %105 = vector.extract_strided_slice %102 {offsets = [0, 64], sizes = [8, 32], strides = [1, 1]} : vector<8x128xf32> to vector<8x32xf32>
    %106 = vector.extract_strided_slice %101 {offsets = [0, 96], sizes = [8, 32], strides = [1, 1]} : vector<8x128xf32> to vector<8x32xf32>
    %107 = arith.mulf %104, %71 : vector<8x32xf32>
    %108 = arith.mulf %103, %105 : vector<8x32xf32>
    %109 = arith.addf %107, %108 : vector<8x32xf32>
    %110 = math.tanh %109 : vector<8x32xf32>
    %111 = arith.mulf %106, %110 : vector<8x32xf32>
    %112 = tpu.concatenate %92, %111 in 1 : vector<8x32xf32>, vector<8x32xf32> -> vector<8x64xf32>
    %cst_33 = arith.constant dense<0.000000e+00> : vector<8x128xf32>
    %113 = tpu.matmul %112, %12, %cst_33 {dimension_numbers = #tpu.dot_dimension_numbers<[1], [0], [0], [1], [0, 0, 1, 1], [], []>} : vector<8x64xf32>, vector<64x128xf32>, vector<8x128xf32> -> vector<8x128xf32>
    %114 = vector.broadcast %13 : vector<1x128xf32> to vector<8x128xf32>
    %115 = arith.addf %113, %114 : vector<8x128xf32>
    %116 = arith.negf %115 : vector<8x128xf32>
    %117 = math.exp %116 : vector<8x128xf32>
    %cst_34 = arith.constant 1.000000e+00 : f32
    %118 = vector.broadcast %cst_34 : f32 to vector<8x128xf32>
    %119 = arith.addf %118, %117 : vector<8x128xf32>
    %120 = arith.divf %118, %119 : vector<8x128xf32>
    %121 = math.tanh %115 : vector<8x128xf32>
    %122 = vector.extract_strided_slice %120 {offsets = [0, 0], sizes = [8, 32], strides = [1, 1]} : vector<8x128xf32> to vector<8x32xf32>
    %123 = vector.extract_strided_slice %120 {offsets = [0, 32], sizes = [8, 32], strides = [1, 1]} : vector<8x128xf32> to vector<8x32xf32>
    %124 = vector.extract_strided_slice %121 {offsets = [0, 64], sizes = [8, 32], strides = [1, 1]} : vector<8x128xf32> to vector<8x32xf32>
    %125 = vector.extract_strided_slice %120 {offsets = [0, 96], sizes = [8, 32], strides = [1, 1]} : vector<8x128xf32> to vector<8x32xf32>
    %126 = arith.mulf %123, %90 : vector<8x32xf32>
    %127 = arith.mulf %122, %124 : vector<8x32xf32>
    %128 = arith.addf %126, %127 : vector<8x32xf32>
    %129 = math.tanh %128 : vector<8x32xf32>
    %130 = arith.mulf %125, %129 : vector<8x32xf32>
    %c16 = arith.constant 16 : index
    %c0_35 = arith.constant 0 : index
    %131 = vector.load %arg11[%c16, %c0_35] : memref<64x32xf32, #tpu.memory_space<vmem>>, vector<8x32xf32>
    tpu.vector_store %arg11[%c16, %c0_35], %130 {strides = array<i32>} : memref<64x32xf32, #tpu.memory_space<vmem>>, vector<8x32xf32>,
    %132 = vector.extract_strided_slice %10 {offsets = [24, 0], sizes = [8, 128], strides = [1, 1]} : vector<64x128xf32> to vector<8x128xf32>
    %cst_36 = arith.constant dense<0.000000e+00> : vector<8x128xf32>
    %133 = tpu.matmul %111, %11, %cst_36 {dimension_numbers = #tpu.dot_dimension_numbers<[1], [0], [0], [1], [0, 0, 1, 1], [], []>} : vector<8x32xf32>, vector<32x128xf32>, vector<8x128xf32> -> vector<8x128xf32>
    %134 = arith.addf %132, %133 : vector<8x128xf32>
    %135 = arith.negf %134 : vector<8x128xf32>
    %136 = math.exp %135 : vector<8x128xf32>
    %cst_37 = arith.constant 1.000000e+00 : f32
    %137 = vector.broadcast %cst_37 : f32 to vector<8x128xf32>
    %138 = arith.addf %137, %136 : vector<8x128xf32>
    %139 = arith.divf %137, %138 : vector<8x128xf32>
    %140 = math.tanh %134 : vector<8x128xf32>
    %141 = vector.extract_strided_slice %139 {offsets = [0, 0], sizes = [8, 32], strides = [1, 1]} : vector<8x128xf32> to vector<8x32xf32>
    %142 = vector.extract_strided_slice %139 {offsets = [0, 32], sizes = [8, 32], strides = [1, 1]} : vector<8x128xf32> to vector<8x32xf32>
    %143 = vector.extract_strided_slice %140 {offsets = [0, 64], sizes = [8, 32], strides = [1, 1]} : vector<8x128xf32> to vector<8x32xf32>
    %144 = vector.extract_strided_slice %139 {offsets = [0, 96], sizes = [8, 32], strides = [1, 1]} : vector<8x128xf32> to vector<8x32xf32>
    %145 = arith.mulf %142, %109 : vector<8x32xf32>
    %146 = arith.mulf %141, %143 : vector<8x32xf32>
    %147 = arith.addf %145, %146 : vector<8x32xf32>
    %148 = math.tanh %147 : vector<8x32xf32>
    %149 = arith.mulf %144, %148 : vector<8x32xf32>
    %150 = tpu.concatenate %130, %149 in 1 : vector<8x32xf32>, vector<8x32xf32> -> vector<8x64xf32>
    %cst_38 = arith.constant dense<0.000000e+00> : vector<8x128xf32>
    %151 = tpu.matmul %150, %12, %cst_38 {dimension_numbers = #tpu.dot_dimension_numbers<[1], [0], [0], [1], [0, 0, 1, 1], [], []>} : vector<8x64xf32>, vector<64x128xf32>, vector<8x128xf32> -> vector<8x128xf32>
    %152 = vector.broadcast %13 : vector<1x128xf32> to vector<8x128xf32>
    %153 = arith.addf %151, %152 : vector<8x128xf32>
    %154 = arith.negf %153 : vector<8x128xf32>
    %155 = math.exp %154 : vector<8x128xf32>
    %cst_39 = arith.constant 1.000000e+00 : f32
    %156 = vector.broadcast %cst_39 : f32 to vector<8x128xf32>
    %157 = arith.addf %156, %155 : vector<8x128xf32>
    %158 = arith.divf %156, %157 : vector<8x128xf32>
    %159 = math.tanh %153 : vector<8x128xf32>
    %160 = vector.extract_strided_slice %158 {offsets = [0, 0], sizes = [8, 32], strides = [1, 1]} : vector<8x128xf32> to vector<8x32xf32>
    %161 = vector.extract_strided_slice %158 {offsets = [0, 32], sizes = [8, 32], strides = [1, 1]} : vector<8x128xf32> to vector<8x32xf32>
    %162 = vector.extract_strided_slice %159 {offsets = [0, 64], sizes = [8, 32], strides = [1, 1]} : vector<8x128xf32> to vector<8x32xf32>
    %163 = vector.extract_strided_slice %158 {offsets = [0, 96], sizes = [8, 32], strides = [1, 1]} : vector<8x128xf32> to vector<8x32xf32>
    %164 = arith.mulf %161, %128 : vector<8x32xf32>
    %165 = arith.mulf %160, %162 : vector<8x32xf32>
    %166 = arith.addf %164, %165 : vector<8x32xf32>
    %167 = math.tanh %166 : vector<8x32xf32>
    %168 = arith.mulf %163, %167 : vector<8x32xf32>
    %c24 = arith.constant 24 : index
    %c0_40 = arith.constant 0 : index
    %169 = vector.load %arg11[%c24, %c0_40] : memref<64x32xf32, #tpu.memory_space<vmem>>, vector<8x32xf32>
    tpu.vector_store %arg11[%c24, %c0_40], %168 {strides = array<i32>} : memref<64x32xf32, #tpu.memory_space<vmem>>, vector<8x32xf32>,
    %170 = vector.extract_strided_slice %10 {offsets = [32, 0], sizes = [8, 128], strides = [1, 1]} : vector<64x128xf32> to vector<8x128xf32>
    %cst_41 = arith.constant dense<0.000000e+00> : vector<8x128xf32>
    %171 = tpu.matmul %149, %11, %cst_41 {dimension_numbers = #tpu.dot_dimension_numbers<[1], [0], [0], [1], [0, 0, 1, 1], [], []>} : vector<8x32xf32>, vector<32x128xf32>, vector<8x128xf32> -> vector<8x128xf32>
    %172 = arith.addf %170, %171 : vector<8x128xf32>
    %173 = arith.negf %172 : vector<8x128xf32>
    %174 = math.exp %173 : vector<8x128xf32>
    %cst_42 = arith.constant 1.000000e+00 : f32
    %175 = vector.broadcast %cst_42 : f32 to vector<8x128xf32>
    %176 = arith.addf %175, %174 : vector<8x128xf32>
    %177 = arith.divf %175, %176 : vector<8x128xf32>
    %178 = math.tanh %172 : vector<8x128xf32>
    %179 = vector.extract_strided_slice %177 {offsets = [0, 0], sizes = [8, 32], strides = [1, 1]} : vector<8x128xf32> to vector<8x32xf32>
    %180 = vector.extract_strided_slice %177 {offsets = [0, 32], sizes = [8, 32], strides = [1, 1]} : vector<8x128xf32> to vector<8x32xf32>
    %181 = vector.extract_strided_slice %178 {offsets = [0, 64], sizes = [8, 32], strides = [1, 1]} : vector<8x128xf32> to vector<8x32xf32>
    %182 = vector.extract_strided_slice %177 {offsets = [0, 96], sizes = [8, 32], strides = [1, 1]} : vector<8x128xf32> to vector<8x32xf32>
    %183 = arith.mulf %180, %147 : vector<8x32xf32>
    %184 = arith.mulf %179, %181 : vector<8x32xf32>
    %185 = arith.addf %183, %184 : vector<8x32xf32>
    %186 = math.tanh %185 : vector<8x32xf32>
    %187 = arith.mulf %182, %186 : vector<8x32xf32>
    %188 = tpu.concatenate %168, %187 in 1 : vector<8x32xf32>, vector<8x32xf32> -> vector<8x64xf32>
    %cst_43 = arith.constant dense<0.000000e+00> : vector<8x128xf32>
    %189 = tpu.matmul %188, %12, %cst_43 {dimension_numbers = #tpu.dot_dimension_numbers<[1], [0], [0], [1], [0, 0, 1, 1], [], []>} : vector<8x64xf32>, vector<64x128xf32>, vector<8x128xf32> -> vector<8x128xf32>
    %190 = vector.broadcast %13 : vector<1x128xf32> to vector<8x128xf32>
    %191 = arith.addf %189, %190 : vector<8x128xf32>
    %192 = arith.negf %191 : vector<8x128xf32>
    %193 = math.exp %192 : vector<8x128xf32>
    %cst_44 = arith.constant 1.000000e+00 : f32
    %194 = vector.broadcast %cst_44 : f32 to vector<8x128xf32>
    %195 = arith.addf %194, %193 : vector<8x128xf32>
    %196 = arith.divf %194, %195 : vector<8x128xf32>
    %197 = math.tanh %191 : vector<8x128xf32>
    %198 = vector.extract_strided_slice %196 {offsets = [0, 0], sizes = [8, 32], strides = [1, 1]} : vector<8x128xf32> to vector<8x32xf32>
    %199 = vector.extract_strided_slice %196 {offsets = [0, 32], sizes = [8, 32], strides = [1, 1]} : vector<8x128xf32> to vector<8x32xf32>
    %200 = vector.extract_strided_slice %197 {offsets = [0, 64], sizes = [8, 32], strides = [1, 1]} : vector<8x128xf32> to vector<8x32xf32>
    %201 = vector.extract_strided_slice %196 {offsets = [0, 96], sizes = [8, 32], strides = [1, 1]} : vector<8x128xf32> to vector<8x32xf32>
    %202 = arith.mulf %199, %166 : vector<8x32xf32>
    %203 = arith.mulf %198, %200 : vector<8x32xf32>
    %204 = arith.addf %202, %203 : vector<8x32xf32>
    %205 = math.tanh %204 : vector<8x32xf32>
    %206 = arith.mulf %201, %205 : vector<8x32xf32>
    %c32 = arith.constant 32 : index
    %c0_45 = arith.constant 0 : index
    %207 = vector.load %arg11[%c32, %c0_45] : memref<64x32xf32, #tpu.memory_space<vmem>>, vector<8x32xf32>
    tpu.vector_store %arg11[%c32, %c0_45], %206 {strides = array<i32>} : memref<64x32xf32, #tpu.memory_space<vmem>>, vector<8x32xf32>,
    %208 = vector.extract_strided_slice %10 {offsets = [40, 0], sizes = [8, 128], strides = [1, 1]} : vector<64x128xf32> to vector<8x128xf32>
    %cst_46 = arith.constant dense<0.000000e+00> : vector<8x128xf32>
    %209 = tpu.matmul %187, %11, %cst_46 {dimension_numbers = #tpu.dot_dimension_numbers<[1], [0], [0], [1], [0, 0, 1, 1], [], []>} : vector<8x32xf32>, vector<32x128xf32>, vector<8x128xf32> -> vector<8x128xf32>
    %210 = arith.addf %208, %209 : vector<8x128xf32>
    %211 = arith.negf %210 : vector<8x128xf32>
    %212 = math.exp %211 : vector<8x128xf32>
    %cst_47 = arith.constant 1.000000e+00 : f32
    %213 = vector.broadcast %cst_47 : f32 to vector<8x128xf32>
    %214 = arith.addf %213, %212 : vector<8x128xf32>
    %215 = arith.divf %213, %214 : vector<8x128xf32>
    %216 = math.tanh %210 : vector<8x128xf32>
    %217 = vector.extract_strided_slice %215 {offsets = [0, 0], sizes = [8, 32], strides = [1, 1]} : vector<8x128xf32> to vector<8x32xf32>
    %218 = vector.extract_strided_slice %215 {offsets = [0, 32], sizes = [8, 32], strides = [1, 1]} : vector<8x128xf32> to vector<8x32xf32>
    %219 = vector.extract_strided_slice %216 {offsets = [0, 64], sizes = [8, 32], strides = [1, 1]} : vector<8x128xf32> to vector<8x32xf32>
    %220 = vector.extract_strided_slice %215 {offsets = [0, 96], sizes = [8, 32], strides = [1, 1]} : vector<8x128xf32> to vector<8x32xf32>
    %221 = arith.mulf %218, %185 : vector<8x32xf32>
    %222 = arith.mulf %217, %219 : vector<8x32xf32>
    %223 = arith.addf %221, %222 : vector<8x32xf32>
    %224 = math.tanh %223 : vector<8x32xf32>
    %225 = arith.mulf %220, %224 : vector<8x32xf32>
    %226 = tpu.concatenate %206, %225 in 1 : vector<8x32xf32>, vector<8x32xf32> -> vector<8x64xf32>
    %cst_48 = arith.constant dense<0.000000e+00> : vector<8x128xf32>
    %227 = tpu.matmul %226, %12, %cst_48 {dimension_numbers = #tpu.dot_dimension_numbers<[1], [0], [0], [1], [0, 0, 1, 1], [], []>} : vector<8x64xf32>, vector<64x128xf32>, vector<8x128xf32> -> vector<8x128xf32>
    %228 = vector.broadcast %13 : vector<1x128xf32> to vector<8x128xf32>
    %229 = arith.addf %227, %228 : vector<8x128xf32>
    %230 = arith.negf %229 : vector<8x128xf32>
    %231 = math.exp %230 : vector<8x128xf32>
    %cst_49 = arith.constant 1.000000e+00 : f32
    %232 = vector.broadcast %cst_49 : f32 to vector<8x128xf32>
    %233 = arith.addf %232, %231 : vector<8x128xf32>
    %234 = arith.divf %232, %233 : vector<8x128xf32>
    %235 = math.tanh %229 : vector<8x128xf32>
    %236 = vector.extract_strided_slice %234 {offsets = [0, 0], sizes = [8, 32], strides = [1, 1]} : vector<8x128xf32> to vector<8x32xf32>
    %237 = vector.extract_strided_slice %234 {offsets = [0, 32], sizes = [8, 32], strides = [1, 1]} : vector<8x128xf32> to vector<8x32xf32>
    %238 = vector.extract_strided_slice %235 {offsets = [0, 64], sizes = [8, 32], strides = [1, 1]} : vector<8x128xf32> to vector<8x32xf32>
    %239 = vector.extract_strided_slice %234 {offsets = [0, 96], sizes = [8, 32], strides = [1, 1]} : vector<8x128xf32> to vector<8x32xf32>
    %240 = arith.mulf %237, %204 : vector<8x32xf32>
    %241 = arith.mulf %236, %238 : vector<8x32xf32>
    %242 = arith.addf %240, %241 : vector<8x32xf32>
    %243 = math.tanh %242 : vector<8x32xf32>
    %244 = arith.mulf %239, %243 : vector<8x32xf32>
    %c40 = arith.constant 40 : index
    %c0_50 = arith.constant 0 : index
    %245 = vector.load %arg11[%c40, %c0_50] : memref<64x32xf32, #tpu.memory_space<vmem>>, vector<8x32xf32>
    tpu.vector_store %arg11[%c40, %c0_50], %244 {strides = array<i32>} : memref<64x32xf32, #tpu.memory_space<vmem>>, vector<8x32xf32>,
    %246 = vector.extract_strided_slice %10 {offsets = [48, 0], sizes = [8, 128], strides = [1, 1]} : vector<64x128xf32> to vector<8x128xf32>
    %cst_51 = arith.constant dense<0.000000e+00> : vector<8x128xf32>
    %247 = tpu.matmul %225, %11, %cst_51 {dimension_numbers = #tpu.dot_dimension_numbers<[1], [0], [0], [1], [0, 0, 1, 1], [], []>} : vector<8x32xf32>, vector<32x128xf32>, vector<8x128xf32> -> vector<8x128xf32>
    %248 = arith.addf %246, %247 : vector<8x128xf32>
    %249 = arith.negf %248 : vector<8x128xf32>
    %250 = math.exp %249 : vector<8x128xf32>
    %cst_52 = arith.constant 1.000000e+00 : f32
    %251 = vector.broadcast %cst_52 : f32 to vector<8x128xf32>
    %252 = arith.addf %251, %250 : vector<8x128xf32>
    %253 = arith.divf %251, %252 : vector<8x128xf32>
    %254 = math.tanh %248 : vector<8x128xf32>
    %255 = vector.extract_strided_slice %253 {offsets = [0, 0], sizes = [8, 32], strides = [1, 1]} : vector<8x128xf32> to vector<8x32xf32>
    %256 = vector.extract_strided_slice %253 {offsets = [0, 32], sizes = [8, 32], strides = [1, 1]} : vector<8x128xf32> to vector<8x32xf32>
    %257 = vector.extract_strided_slice %254 {offsets = [0, 64], sizes = [8, 32], strides = [1, 1]} : vector<8x128xf32> to vector<8x32xf32>
    %258 = vector.extract_strided_slice %253 {offsets = [0, 96], sizes = [8, 32], strides = [1, 1]} : vector<8x128xf32> to vector<8x32xf32>
    %259 = arith.mulf %256, %223 : vector<8x32xf32>
    %260 = arith.mulf %255, %257 : vector<8x32xf32>
    %261 = arith.addf %259, %260 : vector<8x32xf32>
    %262 = math.tanh %261 : vector<8x32xf32>
    %263 = arith.mulf %258, %262 : vector<8x32xf32>
    %264 = tpu.concatenate %244, %263 in 1 : vector<8x32xf32>, vector<8x32xf32> -> vector<8x64xf32>
    %cst_53 = arith.constant dense<0.000000e+00> : vector<8x128xf32>
    %265 = tpu.matmul %264, %12, %cst_53 {dimension_numbers = #tpu.dot_dimension_numbers<[1], [0], [0], [1], [0, 0, 1, 1], [], []>} : vector<8x64xf32>, vector<64x128xf32>, vector<8x128xf32> -> vector<8x128xf32>
    %266 = vector.broadcast %13 : vector<1x128xf32> to vector<8x128xf32>
    %267 = arith.addf %265, %266 : vector<8x128xf32>
    %268 = arith.negf %267 : vector<8x128xf32>
    %269 = math.exp %268 : vector<8x128xf32>
    %cst_54 = arith.constant 1.000000e+00 : f32
    %270 = vector.broadcast %cst_54 : f32 to vector<8x128xf32>
    %271 = arith.addf %270, %269 : vector<8x128xf32>
    %272 = arith.divf %270, %271 : vector<8x128xf32>
    %273 = math.tanh %267 : vector<8x128xf32>
    %274 = vector.extract_strided_slice %272 {offsets = [0, 0], sizes = [8, 32], strides = [1, 1]} : vector<8x128xf32> to vector<8x32xf32>
    %275 = vector.extract_strided_slice %272 {offsets = [0, 32], sizes = [8, 32], strides = [1, 1]} : vector<8x128xf32> to vector<8x32xf32>
    %276 = vector.extract_strided_slice %273 {offsets = [0, 64], sizes = [8, 32], strides = [1, 1]} : vector<8x128xf32> to vector<8x32xf32>
    %277 = vector.extract_strided_slice %272 {offsets = [0, 96], sizes = [8, 32], strides = [1, 1]} : vector<8x128xf32> to vector<8x32xf32>
    %278 = arith.mulf %275, %242 : vector<8x32xf32>
    %279 = arith.mulf %274, %276 : vector<8x32xf32>
    %280 = arith.addf %278, %279 : vector<8x32xf32>
    %281 = math.tanh %280 : vector<8x32xf32>
    %282 = arith.mulf %277, %281 : vector<8x32xf32>
    %c48 = arith.constant 48 : index
    %c0_55 = arith.constant 0 : index
    %283 = vector.load %arg11[%c48, %c0_55] : memref<64x32xf32, #tpu.memory_space<vmem>>, vector<8x32xf32>
    tpu.vector_store %arg11[%c48, %c0_55], %282 {strides = array<i32>} : memref<64x32xf32, #tpu.memory_space<vmem>>, vector<8x32xf32>,
    %284 = vector.extract_strided_slice %10 {offsets = [56, 0], sizes = [8, 128], strides = [1, 1]} : vector<64x128xf32> to vector<8x128xf32>
    %cst_56 = arith.constant dense<0.000000e+00> : vector<8x128xf32>
    %285 = tpu.matmul %263, %11, %cst_56 {dimension_numbers = #tpu.dot_dimension_numbers<[1], [0], [0], [1], [0, 0, 1, 1], [], []>} : vector<8x32xf32>, vector<32x128xf32>, vector<8x128xf32> -> vector<8x128xf32>
    %286 = arith.addf %284, %285 : vector<8x128xf32>
    %287 = arith.negf %286 : vector<8x128xf32>
    %288 = math.exp %287 : vector<8x128xf32>
    %cst_57 = arith.constant 1.000000e+00 : f32
    %289 = vector.broadcast %cst_57 : f32 to vector<8x128xf32>
    %290 = arith.addf %289, %288 : vector<8x128xf32>
    %291 = arith.divf %289, %290 : vector<8x128xf32>
    %292 = math.tanh %286 : vector<8x128xf32>
    %293 = vector.extract_strided_slice %291 {offsets = [0, 0], sizes = [8, 32], strides = [1, 1]} : vector<8x128xf32> to vector<8x32xf32>
    %294 = vector.extract_strided_slice %291 {offsets = [0, 32], sizes = [8, 32], strides = [1, 1]} : vector<8x128xf32> to vector<8x32xf32>
    %295 = vector.extract_strided_slice %292 {offsets = [0, 64], sizes = [8, 32], strides = [1, 1]} : vector<8x128xf32> to vector<8x32xf32>
    %296 = vector.extract_strided_slice %291 {offsets = [0, 96], sizes = [8, 32], strides = [1, 1]} : vector<8x128xf32> to vector<8x32xf32>
    %297 = arith.mulf %294, %261 : vector<8x32xf32>
    %298 = arith.mulf %293, %295 : vector<8x32xf32>
    %299 = arith.addf %297, %298 : vector<8x32xf32>
    %300 = math.tanh %299 : vector<8x32xf32>
    %301 = arith.mulf %296, %300 : vector<8x32xf32>
    %302 = tpu.concatenate %282, %301 in 1 : vector<8x32xf32>, vector<8x32xf32> -> vector<8x64xf32>
    %cst_58 = arith.constant dense<0.000000e+00> : vector<8x128xf32>
    %303 = tpu.matmul %302, %12, %cst_58 {dimension_numbers = #tpu.dot_dimension_numbers<[1], [0], [0], [1], [0, 0, 1, 1], [], []>} : vector<8x64xf32>, vector<64x128xf32>, vector<8x128xf32> -> vector<8x128xf32>
    %304 = vector.broadcast %13 : vector<1x128xf32> to vector<8x128xf32>
    %305 = arith.addf %303, %304 : vector<8x128xf32>
    %306 = arith.negf %305 : vector<8x128xf32>
    %307 = math.exp %306 : vector<8x128xf32>
    %cst_59 = arith.constant 1.000000e+00 : f32
    %308 = vector.broadcast %cst_59 : f32 to vector<8x128xf32>
    %309 = arith.addf %308, %307 : vector<8x128xf32>
    %310 = arith.divf %308, %309 : vector<8x128xf32>
    %311 = math.tanh %305 : vector<8x128xf32>
    %312 = vector.extract_strided_slice %310 {offsets = [0, 0], sizes = [8, 32], strides = [1, 1]} : vector<8x128xf32> to vector<8x32xf32>
    %313 = vector.extract_strided_slice %310 {offsets = [0, 32], sizes = [8, 32], strides = [1, 1]} : vector<8x128xf32> to vector<8x32xf32>
    %314 = vector.extract_strided_slice %311 {offsets = [0, 64], sizes = [8, 32], strides = [1, 1]} : vector<8x128xf32> to vector<8x32xf32>
    %315 = vector.extract_strided_slice %310 {offsets = [0, 96], sizes = [8, 32], strides = [1, 1]} : vector<8x128xf32> to vector<8x32xf32>
    %316 = arith.mulf %313, %280 : vector<8x32xf32>
    %317 = arith.mulf %312, %314 : vector<8x32xf32>
    %318 = arith.addf %316, %317 : vector<8x32xf32>
    %319 = math.tanh %318 : vector<8x32xf32>
    %320 = arith.mulf %315, %319 : vector<8x32xf32>
    %c56 = arith.constant 56 : index
    %c0_60 = arith.constant 0 : index
    %321 = vector.load %arg11[%c56, %c0_60] : memref<64x32xf32, #tpu.memory_space<vmem>>, vector<8x32xf32>
    tpu.vector_store %arg11[%c56, %c0_60], %320 {strides = array<i32>} : memref<64x32xf32, #tpu.memory_space<vmem>>, vector<8x32xf32>,
    %c0_61 = arith.constant 0 : index
    %c0_62 = arith.constant 0 : index
    %322 = vector.load %arg11[%c0_61, %c0_62] : memref<64x32xf32, #tpu.memory_space<vmem>>, vector<64x32xf32>
    %c0_63 = arith.constant 0 : index
    %c0_64 = arith.constant 0 : index
    %323 = vector.load %arg8[%c0_63, %c0_64] : memref<32x128xf32, #tpu.memory_space<vmem>>, vector<32x128xf32>
    %cst_65 = arith.constant dense<0.000000e+00> : vector<64x128xf32>
    %324 = tpu.matmul %322, %323, %cst_65 {dimension_numbers = #tpu.dot_dimension_numbers<[1], [0], [0], [1], [0, 0, 1, 1], [], []>} : vector<64x32xf32>, vector<32x128xf32>, vector<64x128xf32> -> vector<64x128xf32>
    %c0_66 = arith.constant 0 : index
    %c0_67 = arith.constant 0 : index
    %325 = vector.load %arg9[%c0_66, %c0_67] : memref<1x128xf32, #tpu.memory_space<vmem>>, vector<1x128xf32>
    %326 = vector.broadcast %325 : vector<1x128xf32> to vector<64x128xf32>
    %327 = arith.addf %324, %326 : vector<64x128xf32>
    %c0_68 = arith.constant 0 : index
    %c0_69 = arith.constant 0 : index
    %328 = vector.load %arg10[%c0_68, %c0_69] : memref<64x128xf32, #tpu.memory_space<vmem>>, vector<64x128xf32>
    tpu.vector_store %arg10[%c0_68, %c0_69], %327 {strides = array<i32>} : memref<64x128xf32, #tpu.memory_space<vmem>>, vector<64x128xf32>,
    return
  }
}

</mosaic_0001>

<bundles_post_ra>
// kernel: lstm_asr_forward.1
= control target key start
LH: loop header
LB: loop body
LE: loop exit
PB: predicated region body
PF: predicated region fallthrough
CT: control target
= control target key end

     0   :  { %vm52_vm0 = vcmask 326656   ;;  %v1562_v20 = vmov 0.0   ;;  %vm130_vm1 = vcmask 523264   ;;  %s1564_s22 = smov 32   ;;  %vm209_vm6 = vcmask 261120   ;;  %s2105_s1 = inlined_call_operand.vmem [shape: f32[40,64], index: 1, kind: input, shape index: {}]   ;;  %s2106_s2 = inlined_call_operand.vmem [shape: f32[1,64], index: 2, kind: input, shape index: {}]   ;;  %s2107_s0 = inlined_call_operand.vmem [shape: f32[64,40], index: 0, kind: input, shape index: {}]   ;;  %s2108_s3 = inlined_call_operand.vmem [shape: f32[64,128], index: 3, kind: input, shape index: {}]   ;;  %s2109_s4 = inlined_call_operand.vmem [shape: f32[32,128], index: 4, kind: input, shape index: {}]   ;;  %s2110_s5 = inlined_call_operand.vmem [shape: f32[1,128], index: 5, kind: input, shape index: {}]   ;;  %s2111_s6 = inlined_call_operand.vmem [shape: f32[64,128], index: 6, kind: input, shape index: {}]   ;;  %s2112_s7 = inlined_call_operand.vmem [shape: f32[1,128], index: 7, kind: input, shape index: {}]   ;;  %s2113_s8 = inlined_call_operand.vmem [shape: f32[32,128], index: 8, kind: input, shape index: {}]   ;;  %s2114_s9 = inlined_call_operand.vmem [shape: f32[1,128], index: 9, kind: input, shape index: {}]   ;;  %s2115_s10 = inlined_call_operand.vmem [shape: f32[64,128], index: 10, kind: output, shape index: {}]  }
   0x1   :  { %v47_v0 = vld [vmem:[%s2105_s1 + $0x20] sm:$0xff]  ;;  %v46_v1 = vld [vmem:[%s2105_s1 + $0x18] sm:$0xff]  ;;  %v45_v2 = vld [vmem:[%s2105_s1 + $0x10] sm:$0xff] }
   0x2   :  { %88 = vmatpush.msra.mxu0 %v47_v0  ;;  %1416 = vmatpush.msra.mxu1 %v47_v0  ;;  %v44_v3 = vld [vmem:[%s2105_s1 + $0x8] sm:$0xff]  ;;  %v43_v4 = vld [vmem:[%s2105_s1] sm:$0xff]  ;;  %v41_v7 = vld [vmem:[%s2107_s0 + $0x30] sm:$0xff] }
   0x3   :  { %v35_v5 = vld [vmem:[%s2107_s0] sm:$0xff]  ;;  %v36_v6 = vld [vmem:[%s2107_s0 + $0x8] sm:$0xff]  ;;  %v125_v8 = vld [vmem:[%s2108_s3 + $0x38] sm:$0xff] }
   0x4   :  { %89 = vmatpush.msra.mxu0 %v46_v1  ;;  %1417 = vmatpush.msra.mxu1 %v46_v1  ;;  %v124_v9 = vld [vmem:[%s2108_s3 + $0x30] sm:$0xff]  ;;  %v1656_v10 = vld [vmem:[%s2109_s4 + $0x18] sm:$0xff]  ;;  %v123_v12 = vld [vmem:[%s2108_s3 + $0x28] sm:$0xff] }
   0x5   :  { %225 = vmatpush.msra.mxu2 %v1656_v10  ;;  %v1662_v11 = vld [vmem:[%s2109_s4 + $0x10] sm:$0xff]  ;;  %v1670_v13 = vld [vmem:[%s2109_s4 + $0x8] sm:$0xff]  ;;  %v122_v15 = vld [vmem:[%s2108_s3 + $0x20] sm:$0xff] }
   0x6   :  { %90 = vmatpush.msra.mxu0 %v45_v2  ;;  %1418 = vmatpush.msra.mxu1 %v45_v2  ;;  %v37_v14 = vld [vmem:[%s2107_s0 + $0x10] sm:$0xff]  ;;  %v42_v16 = vld [vmem:[%s2107_s0 + $0x38] sm:$0xff]  ;;  %v1686_v17 = vld [vmem:[%s2109_s4] sm:$0xff] }
   0x7   :  { %226 = vmatpush.msra.mxu2 %v1662_v11  ;;  %v121_v18 = vld [vmem:[%s2108_s3 + $0x18] sm:$0xff]  ;;  %v120_v19 = vld [vmem:[%s2108_s3 + $0x10] sm:$0xff]  ;;  %v119_v21 = vld [vmem:[%s2108_s3 + $0x8] sm:$0xff] }
   0x8   :  { %91 = vmatpush.msra.mxu0 %v44_v3  ;;  %1419 = vmatpush.msra.mxu1 %v44_v3  ;;  %v38_v22 = vld [vmem:[%s2107_s0 + $0x18] sm:$0xff]  ;;  %v39_v23 = vld [vmem:[%s2107_s0 + $0x20] sm:$0xff]  ;;  %v40_v24 = vld [vmem:[%s2107_s0 + $0x28] sm:$0xff] }
   0x9   :  { %227 = vmatpush.msra.mxu2 %v1670_v13  ;;  %v118_v25 = vld [vmem:[%s2108_s3] sm:$0xff]  ;;  %s1563_s3 = smov 64  }
   0xa   :  { %92 = vmatpush.msra.mxu0 %v43_v4  ;;  %1420 = vmatpush.msra.mxu1 %v43_v4  ;;  %v1428_v26 = vld [vmem:[%s2106_s2] ss:$0 sm:$0xff]  ;;  %v1745_v4 = vld [vmem:[%s2111_s6 + $0x38] sm:$0xff] }
   0xb   :  { %1361 = vmatmul.msk.f32.vlgmr.msra.gmra.mxu0 %vm52_vm0, %v35_v5  ;;  %1367 = vmatmul.msk.f32.vlgmr.msra.gmra.mxu1 %vm52_vm0, %v41_v7  ;;  %v1733_v43 = vld [vmem:[%s2110_s5] ss:$0 sm:$0xff]  ;;  %v1750_v5 = vld [vmem:[%s2111_s6 + $0x30] sm:$0xff] }
   0xc   :  { %163 = vmatpush.msrb.mxu1 %v125_v8  ;;  %228 = vmatpush.msra.mxu2 %v1686_v17  ;;  %v1766_v7 = vld [vmem:[%s2111_s6 + $0x20] sm:$0xff]  ;;  %v1775_v8 = vld [vmem:[%s2111_s6 + $0x18] sm:$0xff] }
   0xd   :  { %229 = vmatmul.f32.vlgmr.msra.gmra.mxu2 %v1562_v20  ;;  %290 = vmatpush.msra.mxu3 %v1745_v4 }
   0xe   :  { %164 = vmatpush.msrb.mxu1 %v124_v9  ;;  %360 = vmatpush.msrb.mxu2 %v1656_v10  ;;  %v1784_v9 = vld [vmem:[%s2111_s6 + $0x10] sm:$0xff] }
   0xf   :  { %950 = vmatpush.msrb.mxu0 %v1745_v4  ;;  %291 = vmatpush.msra.mxu3 %v1750_v5 }
  0x10   :  { %165 = vmatpush.msrb.mxu1 %v123_v12  ;;  %361 = vmatpush.msrb.mxu2 %v1662_v11  ;;  %v1793_v12 = vld [vmem:[%s2111_s6 + $0x8] sm:$0xff] }
  0x11   :  { %951 = vmatpush.msrb.mxu0 %v1750_v5 }
  0x12   :  { %166 = vmatpush.msrb.mxu1 %v122_v15  ;;  %362 = vmatpush.msrb.mxu2 %v1670_v13 }
  0x13   :  { %1362 = vmatmul.msk.f32.gmra.mxu0 %vm52_vm0, %v36_v6  ;;  %1368 = vmatmul.msk.f32.gmra.mxu1 %vm52_vm0, %v42_v16  ;;  %v1757_v6 = vld [vmem:[%s2111_s6 + $0x28] sm:$0xff]  ;;  %v1810_v16 = vld [vmem:[%s2111_s6] sm:$0xff] }
  0x14   :  { %167 = vmatpush.msrb.mxu1 %v121_v18  ;;  %363 = vmatpush.msrb.mxu2 %v1686_v17 }
  0x15   :  { %292 = vmatpush.msra.mxu3 %v1757_v6  ;;  %952 = vmatpush.msrb.mxu0 %v1757_v6 }
  0x16   :  { %168 = vmatpush.msrb.mxu1 %v120_v19  ;;  %422 = vmatpush.msra.mxu2 %v1745_v4 }
  0x17   :  { %293 = vmatpush.msra.mxu3 %v1766_v7  ;;  %953 = vmatpush.msrb.mxu0 %v1766_v7 }
  0x18   :  { %169 = vmatpush.msrb.mxu1 %v119_v21  ;;  %423 = vmatpush.msra.mxu2 %v1750_v5  ;;  %v1838_v21 = vld [vmem:[%s2112_s7] ss:$0 sm:$0xff] }
  0x19   :  { %294 = vmatpush.msra.mxu3 %v1775_v8  ;;  %954 = vmatpush.msrb.mxu0 %v1775_v8 }
  0x1a   :  { %170 = vmatpush.msrb.mxu1 %v118_v25  ;;  %424 = vmatpush.msra.mxu2 %v1757_v6 }
  0x1b   :  { %1363 = vmatmul.msk.f32.gmra.mxu0 %vm52_vm0, %v37_v14  ;;  %295 = vmatpush.msra.mxu3 %v1784_v9 }
  0x1c   :  { %1082 = vmatpush.msra.mxu1 %v1745_v4  ;;  %425 = vmatpush.msra.mxu2 %v1766_v7 }
  0x1d   :  { %955 = vmatpush.msrb.mxu0 %v1784_v9  ;;  %296 = vmatpush.msra.mxu3 %v1793_v12 }
  0x1e   :  { %1083 = vmatpush.msra.mxu1 %v1750_v5  ;;  %426 = vmatpush.msra.mxu2 %v1775_v8 }
  0x1f   :  { %956 = vmatpush.msrb.mxu0 %v1793_v12  ;;  %297 = vmatpush.msra.mxu3 %v1810_v16 }
  0x20   :  { %1084 = vmatpush.msra.mxu1 %v1757_v6  ;;  %427 = vmatpush.msra.mxu2 %v1784_v9 }
  0x21   :  { %492 = vmatpush.msrb.mxu3 %v1656_v10  ;;  %957 = vmatpush.msrb.mxu0 %v1810_v16 }
  0x22   :  { %1085 = vmatpush.msra.mxu1 %v1766_v7  ;;  %428 = vmatpush.msra.mxu2 %v1793_v12 }
  0x23   :  { %1364 = vmatmul.msk.f32.gmra.mxu0 %vm52_vm0, %v38_v22  ;;  %493 = vmatpush.msrb.mxu3 %v1662_v11 }
  0x24   :  { %1086 = vmatpush.msra.mxu1 %v1775_v8  ;;  %429 = vmatpush.msra.mxu2 %v1810_v16 }
  0x25   :  { %494 = vmatpush.msrb.mxu3 %v1670_v13 }
  0x26   :  { %1087 = vmatpush.msra.mxu1 %v1784_v9 }
  0x27   :  { %495 = vmatpush.msrb.mxu3 %v1686_v17 }
  0x28   :  { %1088 = vmatpush.msra.mxu1 %v1793_v12 }
  0x2a   :  { %1089 = vmatpush.msra.mxu1 %v1810_v16 }
  0x2b   :  { %1365 = vmatmul.msk.f32.gmra.mxu0 %vm52_vm0, %v39_v23 }
  0x33   :  { %1366 = vmatmul.msk.f32.gmra.mxu0 %vm52_vm0, %v40_v24 }
  0x88   :  { %v94_v27 = vpop.f32.mrf.mxu0  ;;  %v112_v39 = vpop.f32.mrf.mxu1 }
  0x89   :  { %v95_v28 = vadd.f32 %v1428_v26, %v94_v27  ;;  %v113_v40 = vadd.f32 %v1428_v26, %v112_v39 }
  0x8b   :  { %1369 = vmatmul.msk.f32.vlgmr.msrb.gmra.mxu1 %vm130_vm1, %v95_v28 }
  0x90   :  { %v97_v29 = vpop.f32.mrf.mxu0  ;;  %v115_v41 = vpop.f32.mrf.mxu1 }
  0x91   :  { %v98_v30 = vadd.f32 %v1428_v26, %v97_v29  ;;  %v116_v42 = vadd.f32 %v1428_v26, %v115_v41  ;;  %v230_v45 = vpop.f32.mrf.mxu2 }
  0x93   :  { %1370 = vmatmul.msk.f32.gmra.mxu1 %vm130_vm1, %v98_v30 }
  0x98   :  { %v100_v31 = vpop.f32.mrf.mxu0 }
  0x99   :  { %v101_v32 = vadd.f32 %v1428_v26, %v100_v31 }
  0x9b   :  { %1371 = vmatmul.msk.f32.gmra.mxu1 %vm130_vm1, %v101_v32 }
  0xa0   :  { %v103_v33 = vpop.f32.mrf.mxu0 }
  0xa1   :  { %v104_v34 = vadd.f32 %v1428_v26, %v103_v33 }
  0xa3   :  { %1372 = vmatmul.msk.f32.gmra.mxu1 %vm130_vm1, %v104_v34 }
  0xa8   :  { %v106_v35 = vpop.f32.mrf.mxu0 }
  0xa9   :  { %v107_v36 = vadd.f32 %v1428_v26, %v106_v35 }
  0xab   :  { %1373 = vmatmul.msk.f32.gmra.mxu1 %vm130_vm1, %v107_v36 }
  0xb0   :  { %v109_v37 = vpop.f32.mrf.mxu0 }
  0xb1   :  { %v110_v38 = vadd.f32 %v1428_v26, %v109_v37 }
  0xb3   :  { %1374 = vmatmul.msk.f32.gmra.mxu1 %vm130_vm1, %v110_v38 }
  0xbb   :  { %1375 = vmatmul.msk.f32.gmra.mxu1 %vm130_vm1, %v113_v40 }
  0xc3   :  { %1376 = vmatmul.msk.f32.gmra.mxu1 %vm130_vm1, %v116_v42 }
 0x108   :  { %v172_v44 = vpop.f32.mrf.mxu1 }
 0x109   :  { %v173_v46 = vadd.f32 %v1733_v43, %v172_v44 }
 0x10b   :  { %v233_v47 = vadd.f32 %v230_v45, %v173_v46 }
 0x10d   :  { %1432 = vtanh.f32 %v233_v47  ;;  %v1377_v49 = vmul.f32 -1.442695, %v233_v47 }
 0x10f   :  { %1434 = vpow2.f32 %v1377_v49 }
 0x110   :  { %v175_v25 = vpop.f32.mrf.mxu1 }
 0x111   :  { %v176_v26 = vadd.f32 %v1733_v43, %v175_v25 }
 0x113   :  { %v1433_v48 = vpop.eup %1432 }
 0x114   :  { %256 = vrot.lane.b32.xlu0 %v1433_v48, %s1563_s3 }
 0x115   :  { %v1435_v50 = vpop.eup %1434 }
 0x116   :  { %v237_v51 = vadd.f32 1.0, %v1435_v50 }
 0x118   :  { %1436 = vrcp.f32 %v237_v51  ;;  %v249_v57 = vand.u32 2147483648, %v237_v51  ;;  %vm243_vm3 = vweird.f32 %v237_v51  ;;  %v247_v58 = vand.u32 2147483647, %v237_v51 }
 0x11a   :  { %v250_v60 = vor.u32 1.1754944e-38, %v249_v57  ;;  %vm248_vm5 = vcmp.eq.f32.partialorder %v247_v58, 8.507059e+37 }
 0x11e   :  { %v1437_v52 = vpop.eup %1436 }
 0x11f   :  { %v239_v53 = vmul.f32 %v1437_v52, %v237_v51  ;;  %vm244_vm2 = vweird.f32 %v1437_v52 }
 0x120   :  { %vm245_vm4 = vmor %vm243_vm3, %vm244_vm2 }
 0x121   :  { %v240_v54 = vsub.f32 1.0, %v239_v53 }
 0x123   :  { %v241_v55 = vmul.f32 %v1437_v52, %v240_v54 }
 0x125   :  { %v242_v56 = vadd.f32 %v1437_v52, %v241_v55 }
 0x127   :  { %v246_v59 = vsel %vm245_vm4, %v1437_v52, %v242_v56 }
 0x128   :  { %v251_v62 = vsel %vm248_vm5, %v250_v60, %v246_v59 }
 0x129   :  { %v254_v0 = vmul.f32 0.0, %v251_v62 }
 0x186   :  { %v257_v61 = vpop.permute.xlu0 %256 }
 0x187   :  { %v259_v63 = vmul.f32 %v257_v61, %v251_v62 }
 0x189   :  { %261 = vrot.lane.b32.xlu0 %v259_v63, %s1564_s22 }
 0x1fb   :  { %v262_v1 = vpop.permute.xlu0 %261 }
 0x1fc   :  { %v1738_v2 = vadd.f32 %v262_v1, %v254_v0 }
 0x1fe   :  { %1438 = vtanh.f32 %v1738_v2 }
 0x204   :  { %v1439_v3 = vpop.eup %1438 }
 0x205   :  { %267 = vrot.lane.b32.xlu1 %v1439_v3, %s1563_s3 }
 0x277   :  { %v268_v14 = vpop.permute.xlu1 %267 }
 0x278   :  { %v270_v15 = vmul.f32 %v268_v14, %v251_v62 }
 0x27a   :  { %272 = vrot.lane.b32.xlu2 %v270_v15, %s1563_s3  ;;  %344 = vrot.lane.b32.xlu1 %v270_v15, %s1564_s22 }
 0x2d4   :  { %v273_v18 = vpop.permute.xlu2 %272 }
 0x2d5   :  { %v275_v19 = vsel %vm209_vm6, 0.0, %v273_v18 }
 0x2d6   :  { %1378 = vmatmul.msk.f32.vlgmr.msra.gmra.mxu3 %vm130_vm1, %v275_v19 }
 0x2d7   :  { %554 = vmatpush.msra.mxu3 %v1745_v4 }
 0x2d9   :  { %555 = vmatpush.msra.mxu3 %v1750_v5 }
 0x2db   :  { %556 = vmatpush.msra.mxu3 %v1757_v6 }
 0x2dd   :  { %557 = vmatpush.msra.mxu3 %v1766_v7 }
 0x2df   :  { %558 = vmatpush.msra.mxu3 %v1775_v8 }
 0x2e1   :  { %559 = vmatpush.msra.mxu3 %v1784_v9 }
 0x2e3   :  { %560 = vmatpush.msra.mxu3 %v1793_v12 }
 0x2e5   :  { %561 = vmatpush.msra.mxu3 %v1810_v16 }
 0x2ec   :  { %v345_v20 = vpop.permute.xlu1 %344 }
 0x2ed   :  { %1380 = vmatmul.msk.f32.vlgmr.msrb.gmra.mxu2 %vm209_vm6, %v345_v20 }
 0x2ee   :  { %624 = vmatpush.msrb.mxu2 %v1656_v10 }
 0x2f0   :  { %625 = vmatpush.msrb.mxu2 %v1662_v11 }
 0x2f2   :  { %626 = vmatpush.msrb.mxu2 %v1670_v13 }
 0x2f4   :  { %627 = vmatpush.msrb.mxu2 %v1686_v17 }
 0x359   :  { %v299_v22 = vpop.f32.mrf.mxu3 }
 0x35a   :  { %v300_v23 = vadd.f32 %v1838_v21, %v299_v22 }
 0x35c   :  { %1440 = vtanh.f32 %v300_v23  ;;  %v1379_v31 = vmul.f32 -1.442695, %v300_v23 }
 0x362   :  { %v1441_v24 = vpop.eup %1440 }
 0x363   :  { %324 = vrot.lane.b32.xlu0 %v1441_v24, %s1563_s3 }
 0x370   :  { %v365_v27 = vpop.f32.mrf.mxu2 }
 0x371   :  { %v368_v28 = vadd.f32 %v365_v27, %v176_v26  ;;  %v178_v26 = vpop.f32.mrf.mxu1 }
 0x372   :  { %v179_v27 = vadd.f32 %v1733_v43, %v178_v26 }
 0x373   :  { %1442 = vtanh.f32 %v368_v28  ;;  %v1381_v30 = vmul.f32 -1.442695, %v368_v28 }
 0x375   :  { %1444 = vpow2.f32 %v1381_v30 }
 0x376   :  { %1446 = vpow2.f32 %v1379_v31 }
 0x379   :  { %v1443_v29 = vpop.eup %1442 }
 0x37a   :  { %391 = vrot.lane.b32.xlu2 %v1443_v29, %s1563_s3 }
 0x37b   :  { %v1445_v32 = vpop.eup %1444 }
 0x37c   :  { %v1447_v33 = vpop.eup %1446  ;;  %v372_v34 = vadd.f32 1.0, %v1445_v32 }
 0x37d   :  { %v305_v35 = vadd.f32 1.0, %v1447_v33 }
 0x37e   :  { %1448 = vrcp.f32 %v372_v34  ;;  %v384_v46 = vand.u32 2147483648, %v372_v34  ;;  %vm378_vm9 = vweird.f32 %v372_v34  ;;  %v382_v48 = vand.u32 2147483647, %v372_v34 }
 0x37f   :  { %1450 = vrcp.f32 %v305_v35  ;;  %v317_v49 = vand.u32 2147483648, %v305_v35  ;;  %vm311_vm11 = vweird.f32 %v305_v35  ;;  %v315_v50 = vand.u32 2147483647, %v305_v35 }
 0x380   :  { %v385_v52 = vor.u32 1.1754944e-38, %v384_v46  ;;  %vm383_vm13 = vcmp.eq.f32.partialorder %v382_v48, 8.507059e+37 }
 0x381   :  { %v318_v54 = vor.u32 1.1754944e-38, %v317_v49  ;;  %vm316_vm14 = vcmp.eq.f32.partialorder %v315_v50, 8.507059e+37 }
 0x384   :  { %v1449_v36 = vpop.eup %1448 }
 0x385   :  { %v1451_v37 = vpop.eup %1450  ;;  %v374_v38 = vmul.f32 %v1449_v36, %v372_v34  ;;  %vm379_vm7 = vweird.f32 %v1449_v36 }
 0x386   :  { %v307_v39 = vmul.f32 %v1451_v37, %v305_v35  ;;  %vm312_vm8 = vweird.f32 %v1451_v37  ;;  %vm380_vm10 = vmor %vm378_vm9, %vm379_vm7 }
 0x387   :  { %v375_v40 = vsub.f32 1.0, %v374_v38  ;;  %vm313_vm12 = vmor %vm311_vm11, %vm312_vm8 }
 0x388   :  { %v308_v41 = vsub.f32 1.0, %v307_v39 }
 0x389   :  { %v376_v42 = vmul.f32 %v1449_v36, %v375_v40 }
 0x38a   :  { %v309_v44 = vmul.f32 %v1451_v37, %v308_v41 }
 0x38b   :  { %v377_v45 = vadd.f32 %v1449_v36, %v376_v42 }
 0x38c   :  { %v310_v47 = vadd.f32 %v1451_v37, %v309_v44 }
 0x38d   :  { %v381_v51 = vsel %vm380_vm10, %v1449_v36, %v377_v45 }
 0x38e   :  { %v314_v53 = vsel %vm313_vm12, %v1451_v37, %v310_v47  ;;  %v386_v56 = vsel %vm383_vm13, %v385_v52, %v381_v51 }
 0x38f   :  { %v319_v59 = vsel %vm316_vm14, %v318_v54, %v314_v53  ;;  %v389_v1 = vmul.f32 %v386_v56, %v1738_v2 }
 0x390   :  { %v322_v61 = vmul.f32 0.0, %v319_v59 }
 0x3d4   :  { %v392_v55 = vpop.permute.xlu2 %391 }
 0x3d5   :  { %v394_v57 = vmul.f32 %v392_v55, %v386_v56  ;;  %v325_v58 = vpop.permute.xlu0 %324 }
 0x3d6   :  { %v327_v60 = vmul.f32 %v325_v58, %v319_v59 }
 0x3d7   :  { %396 = vrot.lane.b32.xlu1 %v394_v57, %s1564_s22 }
 0x3d8   :  { %329 = vrot.lane.b32.xlu2 %v327_v60, %s1564_s22 }
 0x432   :  { %v330_v62 = vpop.permute.xlu2 %329 }
 0x433   :  { %v1846_v63 = vadd.f32 %v330_v62, %v322_v61 }
 0x435   :  { %1452 = vtanh.f32 %v1846_v63 }
 0x43b   :  { %v1453_v0 = vpop.eup %1452 }
 0x43c   :  { %335 = vrot.lane.b32.xlu1 %v1453_v0, %s1563_s3 }
 0x449   :  { %v397_v3 = vpop.permute.xlu1 %396 }
 0x44a   :  { %v1851_v14 = vadd.f32 %v397_v3, %v389_v1 }
 0x44c   :  { %1454 = vtanh.f32 %v1851_v14 }
 0x452   :  { %v1455_v15 = vpop.eup %1454 }
 0x453   :  { %402 = vrot.lane.b32.xlu0 %v1455_v15, %s1563_s3 }
 0x4ae   :  { %v336_v18 = vpop.permute.xlu1 %335 }
 0x4af   :  { %v338_v19 = vmul.f32 %v336_v18, %v319_v59 }
 0x4b1   :  { %340 = vrot.lane.b32.xlu0 %v338_v19, %s1564_s22 }
 0x4c5   :  { %v403_v20 = vpop.permute.xlu0 %402 }
 0x4c6   :  { %v405_v22 = vmul.f32 %v403_v20, %v386_v56 }
 0x4c8   :  { %407 = vrot.lane.b32.xlu1 %v405_v22, %s1563_s3  ;;  %476 = vrot.lane.b32.xlu2 %v405_v22, %s1564_s22 }
 0x522   :  { %v477_v23 = vpop.permute.xlu2 %476 }
 0x523   :  { %1384 = vmatmul.msk.f32.vlgmr.msrb.gmra.mxu3 %vm209_vm6, %v477_v23  ;;  %v341_v2 = vpop.permute.xlu0 %340 }
 0x524   :  { %343 = vst.msk [vmem:[#allocation2] sm:$0xff] %vm209_vm6, %v341_v2  ;;  %756 = vmatpush.msrb.mxu3 %v1656_v10 }
 0x526   :  { %757 = vmatpush.msrb.mxu3 %v1662_v11 }
 0x528   :  { %758 = vmatpush.msrb.mxu3 %v1670_v13 }
 0x52a   :  { %759 = vmatpush.msrb.mxu3 %v1686_v17 }
 0x53a   :  { %v408_v24 = vpop.permute.xlu1 %407 }
 0x53b   :  { %v410_v25 = vsel %vm209_vm6, %v341_v2, %v408_v24 }
 0x53c   :  { %1382 = vmatmul.msk.f32.vlgmr.msra.gmra.mxu2 %vm130_vm1, %v410_v25 }
 0x53d   :  { %686 = vmatpush.msra.mxu2 %v1745_v4 }
 0x53f   :  { %687 = vmatpush.msra.mxu2 %v1750_v5 }
 0x541   :  { %688 = vmatpush.msra.mxu2 %v1757_v6 }
 0x543   :  { %689 = vmatpush.msra.mxu2 %v1766_v7 }
 0x545   :  { %690 = vmatpush.msra.mxu2 %v1775_v8 }
 0x547   :  { %691 = vmatpush.msra.mxu2 %v1784_v9 }
 0x549   :  { %692 = vmatpush.msra.mxu2 %v1793_v12 }
 0x54b   :  { %693 = vmatpush.msra.mxu2 %v1810_v16 }
 0x5a6   :  { %v497_v28 = vpop.f32.mrf.mxu3 }
 0x5a7   :  { %v500_v29 = vadd.f32 %v497_v28, %v179_v27 }
 0x5a9   :  { %1456 = vtanh.f32 %v500_v29  ;;  %v1385_v34 = vmul.f32 -1.442695, %v500_v29 }
 0x5af   :  { %v1457_v30 = vpop.eup %1456 }
 0x5b0   :  { %523 = vrot.lane.b32.xlu2 %v1457_v30, %s1563_s3  ;;  %v181_v30 = vpop.f32.mrf.mxu1 }
 0x5bf   :  { %v431_v31 = vpop.f32.mrf.mxu2 }
 0x5c0   :  { %v432_v32 = vadd.f32 %v1838_v21, %v431_v31  ;;  %v182_v31 = vadd.f32 %v1733_v43, %v181_v30 }
 0x5c2   :  { %1458 = vtanh.f32 %v432_v32  ;;  %v1383_v50 = vmul.f32 -1.442695, %v432_v32 }
 0x5c3   :  { %1460 = vpow2.f32 %v1385_v34 }
 0x5c8   :  { %v1459_v33 = vpop.eup %1458 }
 0x5c9   :  { %456 = vrot.lane.b32.xlu0 %v1459_v33, %s1563_s3  ;;  %v1461_v35 = vpop.eup %1460 }
 0x5ca   :  { %v504_v36 = vadd.f32 1.0, %v1461_v35 }
 0x5cc   :  { %1462 = vrcp.f32 %v504_v36  ;;  %v516_v42 = vand.u32 2147483648, %v504_v36  ;;  %vm510_vm0 = vweird.f32 %v504_v36  ;;  %v514_v44 = vand.u32 2147483647, %v504_v36 }
 0x5cd   :  { %1464 = vpow2.f32 %v1383_v50 }
 0x5ce   :  { %v517_v46 = vor.u32 1.1754944e-38, %v516_v42  ;;  %vm515_vm3 = vcmp.eq.f32.partialorder %v514_v44, 8.507059e+37 }
 0x5d2   :  { %v1463_v37 = vpop.eup %1462 }
 0x5d3   :  { %v506_v38 = vmul.f32 %v1463_v37, %v504_v36  ;;  %vm511_vm15 = vweird.f32 %v1463_v37  ;;  %v1465_v51 = vpop.eup %1464 }
 0x5d4   :  { %vm512_vm2 = vmor %vm510_vm0, %vm511_vm15  ;;  %v437_v52 = vadd.f32 1.0, %v1465_v51 }
 0x5d5   :  { %v507_v39 = vsub.f32 1.0, %v506_v38 }
 0x5d6   :  { %1466 = vrcp.f32 %v437_v52  ;;  %v449_v58 = vand.u32 2147483648, %v437_v52  ;;  %vm443_vm5 = vweird.f32 %v437_v52  ;;  %v447_v59 = vand.u32 2147483647, %v437_v52 }
 0x5d7   :  { %v508_v40 = vmul.f32 %v1463_v37, %v507_v39 }
 0x5d8   :  { %v450_v61 = vor.u32 1.1754944e-38, %v449_v58  ;;  %vm448_vm8 = vcmp.eq.f32.partialorder %v447_v59, 8.507059e+37 }
 0x5d9   :  { %v509_v41 = vadd.f32 %v1463_v37, %v508_v40 }
 0x5db   :  { %v513_v45 = vsel %vm512_vm2, %v1463_v37, %v509_v41 }
 0x5dc   :  { %v518_v48 = vsel %vm515_vm3, %v517_v46, %v513_v45  ;;  %v1467_v53 = vpop.eup %1466 }
 0x5dd   :  { %v439_v54 = vmul.f32 %v1467_v53, %v437_v52  ;;  %vm444_vm4 = vweird.f32 %v1467_v53  ;;  %v521_v3 = vmul.f32 %v518_v48, %v1851_v14 }
 0x5de   :  { %vm445_vm7 = vmor %vm443_vm5, %vm444_vm4 }
 0x5df   :  { %v440_v55 = vsub.f32 1.0, %v439_v54 }
 0x5e1   :  { %v441_v56 = vmul.f32 %v1467_v53, %v440_v55 }
 0x5e3   :  { %v442_v57 = vadd.f32 %v1467_v53, %v441_v56 }
 0x5e5   :  { %v446_v60 = vsel %vm445_vm7, %v1467_v53, %v442_v57 }
 0x5e6   :  { %v451_v0 = vsel %vm448_vm8, %v450_v61, %v446_v60 }
 0x5e7   :  { %v454_v20 = vmul.f32 %v451_v0, %v1846_v63 }
 0x60a   :  { %v524_v47 = vpop.permute.xlu2 %523 }
 0x60b   :  { %v526_v49 = vmul.f32 %v524_v47, %v518_v48 }
 0x60d   :  { %528 = vrot.lane.b32.xlu1 %v526_v49, %s1564_s22 }
 0x63b   :  { %v457_v62 = vpop.permute.xlu0 %456 }
 0x63c   :  { %v459_v1 = vmul.f32 %v457_v62, %v451_v0 }
 0x63e   :  { %461 = vrot.lane.b32.xlu2 %v459_v1, %s1564_s22 }
 0x67f   :  { %v529_v15 = vpop.permute.xlu1 %528 }
 0x680   :  { %v1881_v18 = vadd.f32 %v529_v15, %v521_v3 }
 0x682   :  { %1468 = vtanh.f32 %v1881_v18 }
 0x688   :  { %v1469_v19 = vpop.eup %1468 }
 0x689   :  { %534 = vrot.lane.b32.xlu0 %v1469_v19, %s1563_s3 }
 0x698   :  { %v462_v22 = vpop.permute.xlu2 %461 }
 0x699   :  { %v1886_v23 = vadd.f32 %v462_v22, %v454_v20 }
 0x69b   :  { %1470 = vtanh.f32 %v1886_v23 }
 0x6a1   :  { %v1471_v2 = vpop.eup %1470 }
 0x6a2   :  { %467 = vrot.lane.b32.xlu1 %v1471_v2, %s1563_s3 }
 0x6fb   :  { %v535_v24 = vpop.permute.xlu0 %534 }
 0x6fc   :  { %v537_v14 = vmul.f32 %v535_v24, %v518_v48 }
 0x6fe   :  { %608 = vrot.lane.b32.xlu2 %v537_v14, %s1564_s22  ;;  %539 = vrot.lane.b32.xlu1 %v537_v14, %s1563_s3 }
 0x714   :  { %v468_v25 = vpop.permute.xlu1 %467 }
 0x715   :  { %v470_v26 = vmul.f32 %v468_v25, %v451_v0 }
 0x717   :  { %472 = vrot.lane.b32.xlu0 %v470_v26, %s1564_s22 }
 0x758   :  { %v609_v27 = vpop.permute.xlu2 %608 }
 0x759   :  { %1388 = vmatmul.msk.f32.vlgmr.msrb.gmra.mxu2 %vm209_vm6, %v609_v27 }
 0x75a   :  { %888 = vmatpush.msrb.mxu2 %v1656_v10 }
 0x75c   :  { %889 = vmatpush.msrb.mxu2 %v1662_v11 }
 0x75e   :  { %890 = vmatpush.msrb.mxu2 %v1670_v13 }
 0x760   :  { %891 = vmatpush.msrb.mxu2 %v1686_v17 }
 0x770   :  { %v540_v63 = vpop.permute.xlu1 %539 }
 0x789   :  { %v473_v28 = vpop.permute.xlu0 %472 }
 0x78a   :  { %475 = vst.msk [vmem:[#allocation2 + $0x8] sm:$0xff] %vm209_vm6, %v473_v28  ;;  %v542_v29 = vsel %vm209_vm6, %v473_v28, %v540_v63 }
 0x78b   :  { %1386 = vmatmul.msk.f32.vlgmr.msra.gmra.mxu3 %vm130_vm1, %v542_v29 }
 0x78c   :  { %818 = vmatpush.msra.mxu3 %v1745_v4 }
 0x78e   :  { %819 = vmatpush.msra.mxu3 %v1750_v5 }
 0x790   :  { %820 = vmatpush.msra.mxu3 %v1757_v6 }
 0x792   :  { %821 = vmatpush.msra.mxu3 %v1766_v7 }
 0x794   :  { %822 = vmatpush.msra.mxu3 %v1775_v8 }
 0x796   :  { %823 = vmatpush.msra.mxu3 %v1784_v9 }
 0x798   :  { %824 = vmatpush.msra.mxu3 %v1793_v12 }
 0x79a   :  { %825 = vmatpush.msra.mxu3 %v1810_v16 }
 0x7dc   :  { %v629_v32 = vpop.f32.mrf.mxu2 }
 0x7dd   :  { %v632_v33 = vadd.f32 %v629_v32, %v182_v31 }
 0x7df   :  { %1472 = vtanh.f32 %v632_v33  ;;  %v1389_v37 = vmul.f32 -1.442695, %v632_v33 }
 0x7e5   :  { %v1473_v34 = vpop.eup %1472 }
 0x7e6   :  { %655 = vrot.lane.b32.xlu2 %v1473_v34, %s1563_s3  ;;  %v184_v34 = vpop.f32.mrf.mxu1 }
 0x80e   :  { %v563_v35 = vpop.f32.mrf.mxu3 }
 0x80f   :  { %v564_v36 = vadd.f32 %v1838_v21, %v563_v35  ;;  %v185_v35 = vadd.f32 %v1733_v43, %v184_v34 }
 0x811   :  { %1474 = vtanh.f32 %v564_v36  ;;  %v1387_v54 = vmul.f32 -1.442695, %v564_v36 }
 0x812   :  { %1476 = vpow2.f32 %v1389_v37 }
 0x817   :  { %v1475_v38 = vpop.eup %1474 }
 0x818   :  { %588 = vrot.lane.b32.xlu0 %v1475_v38, %s1563_s3  ;;  %v1477_v39 = vpop.eup %1476 }
 0x819   :  { %v636_v40 = vadd.f32 1.0, %v1477_v39 }
 0x81b   :  { %1478 = vrcp.f32 %v636_v40  ;;  %v648_v47 = vand.u32 2147483648, %v636_v40  ;;  %vm642_vm10 = vweird.f32 %v636_v40  ;;  %v646_v48 = vand.u32 2147483647, %v636_v40 }
 0x81c   :  { %1480 = vpow2.f32 %v1387_v54 }
 0x81d   :  { %v649_v50 = vor.u32 1.1754944e-38, %v648_v47  ;;  %vm647_vm12 = vcmp.eq.f32.partialorder %v646_v48, 8.507059e+37 }
 0x821   :  { %v1479_v41 = vpop.eup %1478 }
 0x822   :  { %v638_v42 = vmul.f32 %v1479_v41, %v636_v40  ;;  %vm643_vm9 = vweird.f32 %v1479_v41  ;;  %v1481_v55 = vpop.eup %1480 }
 0x823   :  { %vm644_vm11 = vmor %vm642_vm10, %vm643_vm9  ;;  %v569_v56 = vadd.f32 1.0, %v1481_v55 }
 0x824   :  { %v639_v44 = vsub.f32 1.0, %v638_v42 }
 0x825   :  { %1482 = vrcp.f32 %v569_v56  ;;  %v581_v62 = vand.u32 2147483648, %v569_v56  ;;  %vm575_vm14 = vweird.f32 %v569_v56  ;;  %v579_v0 = vand.u32 2147483647, %v569_v56 }
 0x826   :  { %v640_v45 = vmul.f32 %v1479_v41, %v639_v44 }
 0x827   :  { %v582_v3 = vor.u32 1.1754944e-38, %v581_v62  ;;  %vm580_vm0 = vcmp.eq.f32.partialorder %v579_v0, 8.507059e+37 }
 0x828   :  { %v641_v46 = vadd.f32 %v1479_v41, %v640_v45 }
 0x82a   :  { %v645_v49 = vsel %vm644_vm11, %v1479_v41, %v641_v46 }
 0x82b   :  { %v650_v52 = vsel %vm647_vm12, %v649_v50, %v645_v49  ;;  %v1483_v57 = vpop.eup %1482 }
 0x82c   :  { %v571_v58 = vmul.f32 %v1483_v57, %v569_v56  ;;  %vm576_vm13 = vweird.f32 %v1483_v57  ;;  %v653_v22 = vmul.f32 %v650_v52, %v1881_v18 }
 0x82d   :  { %vm577_vm15 = vmor %vm575_vm14, %vm576_vm13 }
 0x82e   :  { %v572_v59 = vsub.f32 1.0, %v571_v58 }
 0x830   :  { %v573_v60 = vmul.f32 %v1483_v57, %v572_v59 }
 0x832   :  { %v574_v61 = vadd.f32 %v1483_v57, %v573_v60 }
 0x834   :  { %v578_v1 = vsel %vm577_vm15, %v1483_v57, %v574_v61 }
 0x835   :  { %v583_v19 = vsel %vm580_vm0, %v582_v3, %v578_v1 }
 0x836   :  { %v586_v25 = vmul.f32 %v583_v19, %v1886_v23 }
 0x840   :  { %v656_v51 = vpop.permute.xlu2 %655 }
 0x841   :  { %v658_v53 = vmul.f32 %v656_v51, %v650_v52 }
 0x843   :  { %660 = vrot.lane.b32.xlu1 %v658_v53, %s1564_s22 }
 0x88a   :  { %v589_v15 = vpop.permute.xlu0 %588 }
 0x88b   :  { %v591_v20 = vmul.f32 %v589_v15, %v583_v19 }
 0x88d   :  { %593 = vrot.lane.b32.xlu2 %v591_v20, %s1564_s22 }
 0x8b5   :  { %v661_v2 = vpop.permute.xlu1 %660 }
 0x8b6   :  { %v1916_v24 = vadd.f32 %v661_v2, %v653_v22 }
 0x8b8   :  { %1484 = vtanh.f32 %v1916_v24 }
 0x8be   :  { %v1485_v14 = vpop.eup %1484 }
 0x8bf   :  { %666 = vrot.lane.b32.xlu0 %v1485_v14, %s1563_s3 }
 0x8e7   :  { %v594_v26 = vpop.permute.xlu2 %593 }
 0x8e8   :  { %v1921_v27 = vadd.f32 %v594_v26, %v586_v25 }
 0x8ea   :  { %1486 = vtanh.f32 %v1921_v27 }
 0x8f0   :  { %v1487_v63 = vpop.eup %1486 }
 0x8f1   :  { %599 = vrot.lane.b32.xlu1 %v1487_v63, %s1563_s3 }
 0x931   :  { %v667_v28 = vpop.permute.xlu0 %666 }
 0x932   :  { %v669_v18 = vmul.f32 %v667_v28, %v650_v52 }
 0x934   :  { %671 = vrot.lane.b32.xlu1 %v669_v18, %s1563_s3  ;;  %740 = vrot.lane.b32.xlu2 %v669_v18, %s1564_s22 }
 0x963   :  { %v600_v29 = vpop.permute.xlu1 %599 }
 0x964   :  { %v602_v30 = vmul.f32 %v600_v29, %v583_v19 }
 0x966   :  { %604 = vrot.lane.b32.xlu0 %v602_v30, %s1564_s22 }
 0x98e   :  { %v741_v31 = vpop.permute.xlu2 %740 }
 0x98f   :  { %1392 = vmatmul.msk.f32.vlgmr.msrb.gmra.mxu3 %vm209_vm6, %v741_v31 }
 0x990   :  { %1152 = vmatpush.msrb.mxu3 %v1656_v10 }
 0x992   :  { %1153 = vmatpush.msrb.mxu3 %v1662_v11 }
 0x994   :  { %1154 = vmatpush.msrb.mxu3 %v1670_v13 }
 0x996   :  { %1155 = vmatpush.msrb.mxu3 %v1686_v17 }
 0x9a6   :  { %v672_v23 = vpop.permute.xlu1 %671 }
 0x9d8   :  { %v605_v32 = vpop.permute.xlu0 %604 }
 0x9d9   :  { %607 = vst.msk [vmem:[#allocation2 + $0x10] sm:$0xff] %vm209_vm6, %v605_v32  ;;  %v674_v33 = vsel %vm209_vm6, %v605_v32, %v672_v23 }
 0x9da   :  { %1390 = vmatmul.msk.f32.vlgmr.msra.gmra.mxu2 %vm130_vm1, %v674_v33 }
 0x9db   :  { %1020 = vmatpush.msra.mxu2 %v1656_v10 }
 0x9dd   :  { %1021 = vmatpush.msra.mxu2 %v1662_v11 }
 0x9df   :  { %1022 = vmatpush.msra.mxu2 %v1670_v13 }
 0x9e1   :  { %1023 = vmatpush.msra.mxu2 %v1686_v17 }
 0xa12   :  { %v761_v36 = vpop.f32.mrf.mxu3 }
 0xa13   :  { %v764_v37 = vadd.f32 %v761_v36, %v185_v35 }
 0xa15   :  { %1488 = vtanh.f32 %v764_v37  ;;  %v1393_v39 = vmul.f32 -1.442695, %v764_v37 }
 0xa17   :  { %1490 = vpow2.f32 %v1393_v39 }
 0xa1b   :  { %v1489_v38 = vpop.eup %1488 }
 0xa1c   :  { %787 = vrot.lane.b32.xlu2 %v1489_v38, %s1563_s3 }
 0xa1d   :  { %v1491_v40 = vpop.eup %1490 }
 0xa1e   :  { %v768_v41 = vadd.f32 1.0, %v1491_v40 }
 0xa20   :  { %1492 = vrcp.f32 %v768_v41  ;;  %v780_v47 = vand.u32 2147483648, %v768_v41  ;;  %vm774_vm3 = vweird.f32 %v768_v41  ;;  %v778_v48 = vand.u32 2147483647, %v768_v41 }
 0xa22   :  { %v781_v50 = vor.u32 1.1754944e-38, %v780_v47  ;;  %vm779_vm5 = vcmp.eq.f32.partialorder %v778_v48, 8.507059e+37 }
 0xa26   :  { %v1493_v13 = vpop.eup %1492 }
 0xa27   :  { %v770_v17 = vmul.f32 %v1493_v13, %v768_v41  ;;  %vm775_vm2 = vweird.f32 %v1493_v13 }
 0xa28   :  { %vm776_vm4 = vmor %vm774_vm3, %vm775_vm2 }
 0xa29   :  { %v771_v44 = vsub.f32 1.0, %v770_v17 }
 0xa2b   :  { %v772_v45 = vmul.f32 %v1493_v13, %v771_v44 }
 0xa2d   :  { %v773_v46 = vadd.f32 %v1493_v13, %v772_v45 }
 0xa2f   :  { %v777_v49 = vsel %vm776_vm4, %v1493_v13, %v773_v46 }
 0xa30   :  { %v782_v52 = vsel %vm779_vm5, %v781_v50, %v777_v49 }
 0xa31   :  { %v785_v22 = vmul.f32 %v782_v52, %v1916_v24 }
 0xa5d   :  { %v695_v10 = vpop.f32.mrf.mxu2 }
 0xa5e   :  { %v696_v11 = vadd.f32 %v1838_v21, %v695_v10 }
 0xa60   :  { %1494 = vtanh.f32 %v696_v11  ;;  %v1391_v54 = vmul.f32 -1.442695, %v696_v11 }
 0xa62   :  { %1496 = vpow2.f32 %v1391_v54 }
 0xa66   :  { %v1495_v42 = vpop.eup %1494 }
 0xa67   :  { %720 = vrot.lane.b32.xlu0 %v1495_v42, %s1563_s3 }
 0xa68   :  { %v1497_v55 = vpop.eup %1496 }
 0xa69   :  { %v701_v56 = vadd.f32 1.0, %v1497_v55 }
 0xa6b   :  { %1498 = vrcp.f32 %v701_v56  ;;  %v713_v62 = vand.u32 2147483648, %v701_v56  ;;  %vm707_vm8 = vweird.f32 %v701_v56  ;;  %v711_v0 = vand.u32 2147483647, %v701_v56 }
 0xa6d   :  { %v714_v3 = vor.u32 1.1754944e-38, %v713_v62  ;;  %vm712_vm10 = vcmp.eq.f32.partialorder %v711_v0, 8.507059e+37 }
 0xa71   :  { %v1499_v57 = vpop.eup %1498 }
 0xa72   :  { %v703_v58 = vmul.f32 %v1499_v57, %v701_v56  ;;  %vm708_vm7 = vweird.f32 %v1499_v57 }
 0xa73   :  { %vm709_vm9 = vmor %vm707_vm8, %vm708_vm7 }
 0xa74   :  { %v704_v59 = vsub.f32 1.0, %v703_v58 }
 0xa76   :  { %v788_v51 = vpop.permute.xlu2 %787  ;;  %v705_v60 = vmul.f32 %v1499_v57, %v704_v59 }
 0xa77   :  { %v790_v53 = vmul.f32 %v788_v51, %v782_v52 }
 0xa78   :  { %v706_v61 = vadd.f32 %v1499_v57, %v705_v60 }
 0xa79   :  { %792 = vrot.lane.b32.xlu1 %v790_v53, %s1564_s22 }
 0xa7a   :  { %v710_v1 = vsel %vm709_vm9, %v1499_v57, %v706_v61 }
 0xa7b   :  { %v715_v19 = vsel %vm712_vm10, %v714_v3, %v710_v1 }
 0xa7c   :  { %v718_v26 = vmul.f32 %v715_v19, %v1921_v27 }
 0xad9   :  { %v721_v15 = vpop.permute.xlu0 %720 }
 0xada   :  { %v723_v20 = vmul.f32 %v721_v15, %v715_v19 }
 0xadc   :  { %725 = vrot.lane.b32.xlu2 %v723_v20, %s1564_s22 }
 0xaeb   :  { %v793_v2 = vpop.permute.xlu1 %792 }
 0xaec   :  { %v1947_v14 = vadd.f32 %v793_v2, %v785_v22 }
 0xaee   :  { %1500 = vtanh.f32 %v1947_v14 }
 0xaf4   :  { %v1501_v25 = vpop.eup %1500 }
 0xaf5   :  { %798 = vrot.lane.b32.xlu0 %v1501_v25, %s1563_s3 }
 0xb36   :  { %v726_v63 = vpop.permute.xlu2 %725 }
 0xb37   :  { %v1952_v28 = vadd.f32 %v726_v63, %v718_v26  ;;  %v1279_v26 = vld [vmem:[%s2113_s8 + $0x18] sm:$0xff]  ;;  %v1278_v63 = vld [vmem:[%s2113_s8 + $0x10] sm:$0xff] }
 0xb38   :  { %1320 = vmatpush.msra.mxu0 %v1279_v26 }
 0xb39   :  { %1502 = vtanh.f32 %v1952_v28 }
 0xb3a   :  { %1321 = vmatpush.msra.mxu0 %v1278_v63 }
 0xb3f   :  { %v1503_v18 = vpop.eup %1502 }
 0xb40   :  { %731 = vrot.lane.b32.xlu1 %v1503_v18, %s1563_s3  ;;  %v1276_v18 = vld [vmem:[%s2113_s8] sm:$0xff] }
 0xb67   :  { %v799_v29 = vpop.permute.xlu0 %798 }
 0xb68   :  { %v801_v24 = vmul.f32 %v799_v29, %v782_v52 }
 0xb6a   :  { %803 = vrot.lane.b32.xlu1 %v801_v24, %s1563_s3  ;;  %872 = vrot.lane.b32.xlu2 %v801_v24, %s1564_s22 }
 0xbb2   :  { %v732_v30 = vpop.permute.xlu1 %731 }
 0xbb3   :  { %v734_v31 = vmul.f32 %v732_v30, %v715_v19 }
 0xbb5   :  { %736 = vrot.lane.b32.xlu0 %v734_v31, %s1564_s22 }
 0xbc4   :  { %v873_v23 = vpop.permute.xlu2 %872 }
 0xbc5   :  { %1396 = vmatmul.msk.f32.vlgmr.msrb.gmra.mxu2 %vm209_vm6, %v873_v23  ;;  %v2009_v23 = vld [vmem:[%s2110_s5] ss:$0 sm:$0xff] }
 0xbc6   :  { %1214 = vmatpush.msrb.mxu2 %v1745_v4 }
 0xbc8   :  { %1215 = vmatpush.msrb.mxu2 %v1750_v5  ;;  %v187_v5 = vpop.f32.mrf.mxu1 }
 0xbca   :  { %1216 = vmatpush.msrb.mxu2 %v1757_v6  ;;  %v188_v6 = vadd.f32 %v1733_v43, %v187_v5  ;;  %v1268_v5 = vld [vmem:[#allocation2] sm:$0xff] }
 0xbcc   :  { %1217 = vmatpush.msrb.mxu2 %v1766_v7 }
 0xbce   :  { %1218 = vmatpush.msrb.mxu2 %v1775_v8 }
 0xbd0   :  { %1219 = vmatpush.msrb.mxu2 %v1784_v9  ;;  %v190_v31 = vpop.f32.mrf.mxu1 }
 0xbd2   :  { %1220 = vmatpush.msrb.mxu2 %v1793_v12 }
 0xbd4   :  { %1221 = vmatpush.msrb.mxu2 %v1810_v16 }
 0xbdc   :  { %v804_v27 = vpop.permute.xlu1 %803 }
 0xc27   :  { %v737_v32 = vpop.permute.xlu0 %736 }
 0xc28   :  { %739 = vst.msk [vmem:[#allocation2 + $0x18] sm:$0xff] %vm209_vm6, %v737_v32  ;;  %v806_v4 = vsel %vm209_vm6, %v737_v32, %v804_v27  ;;  %v191_v27 = vadd.f32 %v2009_v23, %v190_v31 }
 0xc29   :  { %1394 = vmatmul.msk.f32.vlgmr.msra.gmra.mxu3 %vm130_vm1, %v806_v4 }
 0xc2a   :  { %1421 = vmatpush.msra.mxu3 %v1279_v26 }
 0xc2c   :  { %1422 = vmatpush.msra.mxu3 %v1278_v63 }
 0xc48   :  { %v893_v7 = vpop.f32.mrf.mxu2 }
 0xc49   :  { %v896_v33 = vadd.f32 %v893_v7, %v188_v6  ;;  %v1269_v7 = vld [vmem:[#allocation2 + $0x8] sm:$0xff] }
 0xc4b   :  { %1504 = vtanh.f32 %v896_v33  ;;  %v1397_v9 = vmul.f32 -1.442695, %v896_v33  ;;  %v1270_v33 = vld [vmem:[#allocation2 + $0x10] sm:$0xff] }
 0xc4d   :  { %1506 = vpow2.f32 %v1397_v9 }
 0xc51   :  { %v1505_v8 = vpop.eup %1504 }
 0xc52   :  { %919 = vrot.lane.b32.xlu2 %v1505_v8, %s1563_s3  ;;  %v1271_v8 = vld [vmem:[#allocation2 + $0x18] sm:$0xff] }
 0xc53   :  { %v1507_v12 = vpop.eup %1506 }
 0xc54   :  { %v900_v16 = vadd.f32 1.0, %v1507_v12 }
 0xc56   :  { %1508 = vrcp.f32 %v900_v16  ;;  %v912_v39 = vand.u32 2147483648, %v900_v16  ;;  %vm906_vm12 = vweird.f32 %v900_v16  ;;  %v910_v43 = vand.u32 2147483647, %v900_v16 }
 0xc58   :  { %v913_v41 = vor.u32 1.1754944e-38, %v912_v39  ;;  %vm911_vm14 = vcmp.eq.f32.partialorder %v910_v43, 8.507059e+37 }
 0xc5c   :  { %v1509_v34 = vpop.eup %1508 }
 0xc5d   :  { %v902_v35 = vmul.f32 %v1509_v34, %v900_v16  ;;  %vm907_vm11 = vweird.f32 %v1509_v34 }
 0xc5e   :  { %vm908_vm13 = vmor %vm906_vm12, %vm907_vm11 }
 0xc5f   :  { %v903_v36 = vsub.f32 1.0, %v902_v35 }
 0xc61   :  { %v904_v37 = vmul.f32 %v1509_v34, %v903_v36 }
 0xc63   :  { %v905_v38 = vadd.f32 %v1509_v34, %v904_v37 }
 0xc65   :  { %v909_v40 = vsel %vm908_vm13, %v1509_v34, %v905_v38 }
 0xc66   :  { %v914_v11 = vsel %vm911_vm14, %v913_v41, %v909_v40 }
 0xc67   :  { %v917_v52 = vmul.f32 %v914_v11, %v1947_v14 }
 0xcac   :  { %v920_v10 = vpop.permute.xlu2 %919  ;;  %v827_v13 = vpop.f32.mrf.mxu3 }
 0xcad   :  { %v922_v17 = vmul.f32 %v920_v10, %v914_v11  ;;  %v828_v42 = vadd.f32 %v1838_v21, %v827_v13 }
 0xcaf   :  { %1510 = vtanh.f32 %v828_v42  ;;  %924 = vrot.lane.b32.xlu1 %v922_v17, %s1564_s22  ;;  %v1395_v45 = vmul.f32 -1.442695, %v828_v42 }
 0xcb1   :  { %1512 = vpow2.f32 %v1395_v45  ;;  %v2023_v45 = vld [vmem:[%s2114_s9] ss:$0 sm:$0xff] }
 0xcb5   :  { %v1511_v44 = vpop.eup %1510 }
 0xcb6   :  { %852 = vrot.lane.b32.xlu0 %v1511_v44, %s1563_s3 }
 0xcb7   :  { %v1513_v46 = vpop.eup %1512 }
 0xcb8   :  { %v833_v47 = vadd.f32 1.0, %v1513_v46 }
 0xcba   :  { %1514 = vrcp.f32 %v833_v47  ;;  %v845_v56 = vand.u32 2147483648, %v833_v47  ;;  %vm839_vm0 = vweird.f32 %v833_v47  ;;  %v843_v57 = vand.u32 2147483647, %v833_v47 }
 0xcbc   :  { %v846_v59 = vor.u32 1.1754944e-38, %v845_v56  ;;  %vm844_vm3 = vcmp.eq.f32.partialorder %v843_v57, 8.507059e+37 }
 0xcc0   :  { %v1515_v48 = vpop.eup %1514 }
 0xcc1   :  { %v835_v49 = vmul.f32 %v1515_v48, %v833_v47  ;;  %vm840_vm15 = vweird.f32 %v1515_v48 }
 0xcc2   :  { %vm841_vm2 = vmor %vm839_vm0, %vm840_vm15 }
 0xcc3   :  { %v836_v50 = vsub.f32 1.0, %v835_v49 }
 0xcc5   :  { %v837_v51 = vmul.f32 %v1515_v48, %v836_v50 }
 0xcc7   :  { %v838_v54 = vadd.f32 %v1515_v48, %v837_v51 }
 0xcc9   :  { %v842_v58 = vsel %vm841_vm2, %v1515_v48, %v838_v54 }
 0xcca   :  { %v847_v61 = vsel %vm844_vm3, %v846_v59, %v842_v58 }
 0xccb   :  { %v850_v1 = vmul.f32 %v847_v61, %v1952_v28  ;;  %v1277_v28 = vld [vmem:[%s2113_s8 + $0x8] sm:$0xff] }
 0xccc   :  { %1322 = vmatpush.msra.mxu0 %v1277_v28  ;;  %1423 = vmatpush.msra.mxu3 %v1277_v28 }
 0xcce   :  { %1323 = vmatpush.msra.mxu0 %v1276_v18  ;;  %1424 = vmatpush.msra.mxu3 %v1276_v18 }
 0xd21   :  { %v925_v53 = vpop.permute.xlu1 %924 }
 0xd22   :  { %v1977_v55 = vadd.f32 %v925_v53, %v917_v52 }
 0xd24   :  { %1516 = vtanh.f32 %v1977_v55 }
 0xd28   :  { %v853_v60 = vpop.permute.xlu0 %852 }
 0xd29   :  { %v855_v62 = vmul.f32 %v853_v60, %v847_v61 }
 0xd2a   :  { %v1517_v0 = vpop.eup %1516 }
 0xd2b   :  { %857 = vrot.lane.b32.xlu2 %v855_v62, %s1564_s22  ;;  %930 = vrot.lane.b32.xlu0 %v1517_v0, %s1563_s3 }
 0xd85   :  { %v858_v3 = vpop.permute.xlu2 %857 }
 0xd86   :  { %v1983_v15 = vadd.f32 %v858_v3, %v850_v1 }
 0xd88   :  { %1518 = vtanh.f32 %v1983_v15 }
 0xd8e   :  { %v1519_v19 = vpop.eup %1518 }
 0xd8f   :  { %863 = vrot.lane.b32.xlu1 %v1519_v19, %s1563_s3 }
 0xd9d   :  { %v931_v20 = vpop.permute.xlu0 %930 }
 0xd9e   :  { %v933_v22 = vmul.f32 %v931_v20, %v914_v11 }
 0xda0   :  { %935 = vrot.lane.b32.xlu1 %v933_v22, %s1563_s3  ;;  %1004 = vrot.lane.b32.xlu2 %v933_v22, %s1564_s22 }
 0xdfa   :  { %v1005_v2 = vpop.permute.xlu2 %1004 }
 0xdfb   :  { %1400 = vmatmul.msk.f32.vlgmr.msra.gmra.mxu2 %vm209_vm6, %v1005_v2 }
 0xe01   :  { %v864_v14 = vpop.permute.xlu1 %863 }
 0xe02   :  { %v866_v25 = vmul.f32 %v864_v14, %v847_v61 }
 0xe04   :  { %868 = vrot.lane.b32.xlu0 %v866_v25, %s1564_s22 }
 0xe12   :  { %v936_v29 = vpop.permute.xlu1 %935 }
 0xe76   :  { %v869_v24 = vpop.permute.xlu0 %868 }
 0xe77   :  { %871 = vst.msk [vmem:[#allocation2 + $0x20] sm:$0xff] %vm209_vm6, %v869_v24  ;;  %v938_v30 = vsel %vm209_vm6, %v869_v24, %v936_v29 }
 0xe78   :  { %1398 = vmatmul.msk.f32.vlgmr.msrb.gmra.mxu0 %vm130_vm1, %v938_v30 }
 0xe7e   :  { %v1025_v32 = vpop.f32.mrf.mxu2  ;;  %v1272_v9 = vld [vmem:[#allocation2 + $0x20] sm:$0xff] }
 0xe7f   :  { %v1028_v4 = vadd.f32 %v1025_v32, %v191_v27 }
 0xe80   :  { %1408 = vmatmul.msk.f32.vlgmr.msra.gmra.mxu0 %vm209_vm6, %v1268_v5 }
 0xe81   :  { %1520 = vtanh.f32 %v1028_v4  ;;  %v1401_v12 = vmul.f32 -1.442695, %v1028_v4 }
 0xe83   :  { %1522 = vpow2.f32 %v1401_v12 }
 0xe87   :  { %v1521_v6 = vpop.eup %1520 }
 0xe88   :  { %1051 = vrot.lane.b32.xlu2 %v1521_v6, %s1563_s3  ;;  %1409 = vmatmul.msk.f32.gmra.mxu0 %vm209_vm6, %v1269_v7 }
 0xe89   :  { %v1523_v16 = vpop.eup %1522 }
 0xe8a   :  { %v1032_v34 = vadd.f32 1.0, %v1523_v16 }
 0xe8c   :  { %1524 = vrcp.f32 %v1032_v34  ;;  %v1044_v43 = vand.u32 2147483648, %v1032_v34  ;;  %vm1038_vm5 = vweird.f32 %v1032_v34  ;;  %v1042_v40 = vand.u32 2147483647, %v1032_v34 }
 0xe8e   :  { %v1045_v10 = vor.u32 1.1754944e-38, %v1044_v43  ;;  %vm1043_vm8 = vcmp.eq.f32.partialorder %v1042_v40, 8.507059e+37  ;;  %v2070_v40 = vld [vmem:[%s2112_s7] ss:$0 sm:$0xff] }
 0xe90   :  { %1410 = vmatmul.msk.f32.gmra.mxu0 %vm209_vm6, %v1270_v33 }
 0xe92   :  { %v1525_v35 = vpop.eup %1524 }
 0xe93   :  { %v1034_v36 = vmul.f32 %v1525_v35, %v1032_v34  ;;  %vm1039_vm4 = vweird.f32 %v1525_v35 }
 0xe94   :  { %vm1040_vm7 = vmor %vm1038_vm5, %vm1039_vm4 }
 0xe95   :  { %v1035_v37 = vsub.f32 1.0, %v1034_v36 }
 0xe97   :  { %v1036_v38 = vmul.f32 %v1525_v35, %v1035_v37 }
 0xe98   :  { %1411 = vmatmul.msk.f32.gmra.mxu0 %vm209_vm6, %v1271_v8 }
 0xe99   :  { %v1037_v39 = vadd.f32 %v1525_v35, %v1036_v38 }
 0xe9b   :  { %v1041_v41 = vsel %vm1040_vm7, %v1525_v35, %v1037_v39 }
 0xe9c   :  { %v1046_v13 = vsel %vm1043_vm8, %v1045_v10, %v1041_v41 }
 0xe9d   :  { %v1049_v60 = vmul.f32 %v1046_v13, %v1977_v55 }
 0xea0   :  { %1412 = vmatmul.msk.f32.gmra.mxu0 %vm209_vm6, %v1272_v9 }
 0xee2   :  { %v1052_v11 = vpop.permute.xlu2 %1051 }
 0xee3   :  { %v1054_v17 = vmul.f32 %v1052_v11, %v1046_v13 }
 0xee5   :  { %1056 = vrot.lane.b32.xlu1 %v1054_v17, %s1564_s22 }
 0xef5   :  { %v959_v42 = vpop.f32.mrf.mxu0 }
 0xef6   :  { %v960_v44 = vadd.f32 %v1838_v21, %v959_v42 }
 0xef8   :  { %1526 = vtanh.f32 %v960_v44  ;;  %v1399_v57 = vmul.f32 -1.442695, %v960_v44 }
 0xefa   :  { %1528 = vpow2.f32 %v1399_v57 }
 0xefd   :  { %v1325_v46 = vpop.f32.mrf.mxu0 }
 0xefe   :  { %v1527_v47 = vpop.eup %1526  ;;  %v1326_v48 = vadd.f32 %v2023_v45, %v1325_v46 }
 0xeff   :  { %984 = vrot.lane.b32.xlu0 %v1527_v47, %s1563_s3 }
 0xf00   :  { %1349 = vst [vmem:[%s2115_s10] sm:$0xff] %v1326_v48  ;;  %v1529_v58 = vpop.eup %1528 }
 0xf01   :  { %v965_v59 = vadd.f32 1.0, %v1529_v58 }
 0xf03   :  { %1530 = vrcp.f32 %v965_v59  ;;  %v977_v2 = vand.u32 2147483648, %v965_v59  ;;  %vm971_vm10 = vweird.f32 %v965_v59  ;;  %v975_v14 = vand.u32 2147483647, %v965_v59 }
 0xf05   :  { %v1328_v49 = vpop.f32.mrf.mxu0  ;;  %v978_v55 = vor.u32 1.1754944e-38, %v977_v2  ;;  %vm976_vm12 = vcmp.eq.f32.partialorder %v975_v14, 8.507059e+37 }
 0xf06   :  { %v1329_v50 = vadd.f32 %v2023_v45, %v1328_v49 }
 0xf08   :  { %1350 = vst [vmem:[%s2115_s10 + $0x8] sm:$0xff] %v1329_v50 }
 0xf09   :  { %v1531_v0 = vpop.eup %1530 }
 0xf0a   :  { %v967_v1 = vmul.f32 %v1531_v0, %v965_v59  ;;  %vm972_vm9 = vweird.f32 %v1531_v0 }
 0xf0b   :  { %vm973_vm11 = vmor %vm971_vm10, %vm972_vm9 }
 0xf0c   :  { %v968_v19 = vsub.f32 1.0, %v967_v1 }
 0xf0d   :  { %v1331_v21 = vpop.f32.mrf.mxu0 }
 0xf0e   :  { %v1332_v51 = vadd.f32 %v2023_v45, %v1331_v21  ;;  %v969_v20 = vmul.f32 %v1531_v0, %v968_v19 }
 0xf10   :  { %1351 = vst [vmem:[%s2115_s10 + $0x10] sm:$0xff] %v1332_v51  ;;  %v970_v22 = vadd.f32 %v1531_v0, %v969_v20 }
 0xf12   :  { %v974_v25 = vsel %vm973_vm11, %v1531_v0, %v970_v22 }
 0xf13   :  { %v979_v63 = vsel %vm976_vm12, %v978_v55, %v974_v25 }
 0xf14   :  { %v982_v18 = vmul.f32 %v979_v63, %v1983_v15  ;;  %v193_v15 = vpop.f32.mrf.mxu1 }
 0xf15   :  { %v1334_v52 = vpop.f32.mrf.mxu0  ;;  %v194_v6 = vadd.f32 %v2009_v23, %v193_v15 }
 0xf16   :  { %v1335_v53 = vadd.f32 %v2023_v45, %v1334_v52 }
 0xf18   :  { %1352 = vst [vmem:[%s2115_s10 + $0x18] sm:$0xff] %v1335_v53 }
 0xf1d   :  { %v1337_v54 = vpop.f32.mrf.mxu0 }
 0xf1e   :  { %v1338_v56 = vadd.f32 %v2023_v45, %v1337_v54 }
 0xf20   :  { %1353 = vst [vmem:[%s2115_s10 + $0x20] sm:$0xff] %v1338_v56 }
 0xf57   :  { %v1057_v61 = vpop.permute.xlu1 %1056 }
 0xf58   :  { %v2047_v62 = vadd.f32 %v1057_v61, %v1049_v60 }
 0xf5a   :  { %1532 = vtanh.f32 %v2047_v62 }
 0xf60   :  { %v1533_v3 = vpop.eup %1532 }
 0xf61   :  { %1062 = vrot.lane.b32.xlu0 %v1533_v3, %s1563_s3 }
 0xf71   :  { %v985_v26 = vpop.permute.xlu0 %984 }
 0xf72   :  { %v987_v28 = vmul.f32 %v985_v26, %v979_v63 }
 0xf74   :  { %989 = vrot.lane.b32.xlu2 %v987_v28, %s1564_s22 }
 0xfce   :  { %v990_v29 = vpop.permute.xlu2 %989 }
 0xfcf   :  { %v2053_v24 = vadd.f32 %v990_v29, %v982_v18 }
 0xfd1   :  { %1534 = vtanh.f32 %v2053_v24 }
 0xfd3   :  { %v1063_v30 = vpop.permute.xlu0 %1062 }
 0xfd4   :  { %v1065_v31 = vmul.f32 %v1063_v30, %v1046_v13 }
 0xfd6   :  { %1136 = vrot.lane.b32.xlu2 %v1065_v31, %s1564_s22 }
 0xfd7   :  { %v1535_v27 = vpop.eup %1534 }
 0xfd8   :  { %995 = vrot.lane.b32.xlu1 %v1535_v27, %s1563_s3 }
 0xfe0   :  { %1067 = vrot.lane.b32.xlu1 %v1065_v31, %s1563_s3 }
0x1030   :  { %v1137_v32 = vpop.permute.xlu2 %1136 }
0x1031   :  { %1404 = vmatmul.msk.f32.vlgmr.msrb.gmra.mxu3 %vm209_vm6, %v1137_v32 }
0x104a   :  { %v996_v4 = vpop.permute.xlu1 %995 }
0x104b   :  { %v998_v5 = vmul.f32 %v996_v4, %v979_v63 }
0x104d   :  { %1000 = vrot.lane.b32.xlu0 %v998_v5, %s1564_s22 }
0x1052   :  { %v1068_v9 = vpop.permute.xlu1 %1067 }
0x10b4   :  { %v1157_v7 = vpop.f32.mrf.mxu3 }
0x10b5   :  { %v1160_v33 = vadd.f32 %v1157_v7, %v194_v6 }
0x10b7   :  { %1536 = vtanh.f32 %v1160_v33  ;;  %v1405_v35 = vmul.f32 -1.442695, %v1160_v33 }
0x10b9   :  { %1538 = vpow2.f32 %v1405_v35 }
0x10bd   :  { %v1537_v8 = vpop.eup %1536 }
0x10be   :  { %1183 = vrot.lane.b32.xlu0 %v1537_v8, %s1563_s3 }
0x10bf   :  { %v1001_v12 = vpop.permute.xlu0 %1000  ;;  %v1539_v23 = vpop.eup %1538 }
0x10c0   :  { %1003 = vst.msk [vmem:[#allocation2 + $0x28] sm:$0xff] %vm209_vm6, %v1001_v12  ;;  %v1070_v16 = vsel %vm209_vm6, %v1001_v12, %v1068_v9  ;;  %v1164_v36 = vadd.f32 1.0, %v1539_v23 }
0x10c1   :  { %1402 = vmatmul.msk.f32.vlgmr.msra.gmra.mxu1 %vm130_vm1, %v1070_v16 }
0x10c2   :  { %1540 = vrcp.f32 %v1164_v36  ;;  %v1176_v17 = vand.u32 2147483648, %v1164_v36  ;;  %vm1170_vm14 = vweird.f32 %v1164_v36  ;;  %v1174_v42 = vand.u32 2147483647, %v1164_v36 }
0x10c4   :  { %v1177_v46 = vor.u32 1.1754944e-38, %v1176_v17  ;;  %vm1175_vm0 = vcmp.eq.f32.partialorder %v1174_v42, 8.507059e+37 }
0x10c7   :  { %v1273_v34 = vld [vmem:[#allocation2 + $0x28] sm:$0xff] }
0x10c8   :  { %1413 = vmatmul.msk.f32.vlgmr.msra.gmra.mxu3 %vm209_vm6, %v1273_v34  ;;  %v1541_v37 = vpop.eup %1540 }
0x10c9   :  { %v1166_v38 = vmul.f32 %v1541_v37, %v1164_v36  ;;  %vm1171_vm13 = vweird.f32 %v1541_v37 }
0x10ca   :  { %vm1172_vm15 = vmor %vm1170_vm14, %vm1171_vm13 }
0x10cb   :  { %v1167_v39 = vsub.f32 1.0, %v1166_v38 }
0x10cd   :  { %v1168_v10 = vmul.f32 %v1541_v37, %v1167_v39 }
0x10cf   :  { %v1169_v11 = vadd.f32 %v1541_v37, %v1168_v10 }
0x10d1   :  { %v1173_v44 = vsel %vm1172_vm15, %v1541_v37, %v1169_v11 }
0x10d2   :  { %v1178_v50 = vsel %vm1175_vm0, %v1177_v46, %v1173_v44 }
0x10d3   :  { %v1181_v22 = vmul.f32 %v1178_v50, %v2047_v62 }
0x1130   :  { %v1184_v47 = vpop.permute.xlu0 %1183 }
0x1131   :  { %v1186_v21 = vmul.f32 %v1184_v47, %v1178_v50 }
0x113e   :  { %v1091_v43 = vpop.f32.mrf.mxu1 }
0x113f   :  { %v1092_v41 = vadd.f32 %v2070_v40, %v1091_v43 }
0x1141   :  { %1542 = vtanh.f32 %v1092_v41  ;;  %v1403_v51 = vmul.f32 -1.442695, %v1092_v41 }
0x1143   :  { %1544 = vpow2.f32 %v1403_v51 }
0x1147   :  { %v1543_v13 = vpop.eup %1542 }
0x1148   :  { %1116 = vrot.lane.b32.xlu2 %v1543_v13, %s1563_s3 }
0x1149   :  { %v1545_v52 = vpop.eup %1544 }
0x114a   :  { %v1097_v53 = vadd.f32 1.0, %v1545_v52 }
0x114b   :  { %v1340_v48 = vpop.f32.mrf.mxu3 }
0x114c   :  { %v1341_v49 = vadd.f32 %v2023_v45, %v1340_v48  ;;  %1546 = vrcp.f32 %v1097_v53  ;;  %v1109_v60 = vand.u32 2147483648, %v1097_v53  ;;  %vm1103_vm3 = vweird.f32 %v1097_v53 }
0x114d   :  { %v1107_v61 = vand.u32 2147483647, %v1097_v53 }
0x114e   :  { %1354 = vst [vmem:[%s2115_s10 + $0x28] sm:$0xff] %v1341_v49  ;;  %v1110_v1 = vor.u32 1.1754944e-38, %v1109_v60 }
0x114f   :  { %vm1108_vm5 = vcmp.eq.f32.partialorder %v1107_v61, 8.507059e+37 }
0x1150   :  { %1188 = vrot.lane.b32.xlu2 %v1186_v21, %s1564_s22 }
0x1152   :  { %v1547_v54 = vpop.eup %1546 }
0x1153   :  { %v1099_v56 = vmul.f32 %v1547_v54, %v1097_v53  ;;  %vm1104_vm2 = vweird.f32 %v1547_v54 }
0x1154   :  { %vm1105_vm4 = vmor %vm1103_vm3, %vm1104_vm2 }
0x1155   :  { %v1100_v57 = vsub.f32 1.0, %v1099_v56 }
0x1157   :  { %v1101_v58 = vmul.f32 %v1547_v54, %v1100_v57 }
0x1159   :  { %v1102_v59 = vadd.f32 %v1547_v54, %v1101_v58 }
0x115b   :  { %v1106_v0 = vsel %vm1105_vm4, %v1547_v54, %v1102_v59 }
0x115c   :  { %v1111_v19 = vsel %vm1108_vm5, %v1110_v1, %v1106_v0 }
0x115d   :  { %v1114_v55 = vmul.f32 %v1111_v19, %v2053_v24 }
0x11a2   :  { %v1117_v3 = vpop.permute.xlu2 %1116 }
0x11a3   :  { %v1119_v20 = vmul.f32 %v1117_v3, %v1111_v19 }
0x11a5   :  { %1121 = vrot.lane.b32.xlu1 %v1119_v20, %s1564_s22 }
0x11aa   :  { %v1189_v2 = vpop.permute.xlu2 %1188 }
0x11ab   :  { %v1191_v14 = vadd.f32 %v1189_v2, %v1181_v22 }
0x11ad   :  { %1548 = vtanh.f32 %v1191_v14 }
0x11b3   :  { %v1549_v25 = vpop.eup %1548 }
0x11b4   :  { %1194 = vrot.lane.b32.xlu1 %v1549_v25, %s1563_s3 }
0x1217   :  { %v1122_v26 = vpop.permute.xlu1 %1121 }
0x1218   :  { %v1124_v63 = vadd.f32 %v1122_v26, %v1114_v55 }
0x121a   :  { %1550 = vtanh.f32 %v1124_v63 }
0x1220   :  { %v1551_v28 = vpop.eup %1550 }
0x1221   :  { %1127 = vrot.lane.b32.xlu0 %v1551_v28, %s1563_s3 }
0x1226   :  { %v1195_v18 = vpop.permute.xlu1 %1194 }
0x1227   :  { %v1197_v29 = vmul.f32 %v1195_v18, %v1178_v50 }
0x1229   :  { %1199 = vrot.lane.b32.xlu0 %v1197_v29, %s1563_s3 }
0x1293   :  { %v1128_v30 = vpop.permute.xlu0 %1127 }
0x1294   :  { %v1130_v62 = vmul.f32 %v1128_v30, %v1111_v19 }
0x1296   :  { %1132 = vrot.lane.b32.xlu2 %v1130_v62, %s1564_s22 }
0x129b   :  { %v1200_v31 = vpop.permute.xlu0 %1199 }
0x12f0   :  { %v1133_v27 = vpop.permute.xlu2 %1132 }
0x12f1   :  { %1135 = vst.msk [vmem:[#allocation2 + $0x30] sm:$0xff] %vm209_vm6, %v1133_v27  ;;  %v1202_v24 = vsel %vm209_vm6, %v1133_v27, %v1200_v31 }
0x12f2   :  { %1406 = vmatmul.msk.f32.vlgmr.msrb.gmra.mxu2 %vm130_vm1, %v1202_v24 }
0x12f8   :  { %v1274_v32 = vld [vmem:[#allocation2 + $0x30] sm:$0xff] }
0x12f9   :  { %1414 = vmatmul.msk.f32.gmra.mxu3 %vm209_vm6, %v1274_v32 }
0x1375   :  { %v1223_v4 = vpop.f32.mrf.mxu2 }
0x1376   :  { %v1224_v5 = vadd.f32 %v2070_v40, %v1223_v4 }
0x1378   :  { %1552 = vtanh.f32 %v1224_v5  ;;  %v1407_v33 = vmul.f32 -1.442695, %v1224_v5 }
0x137a   :  { %1554 = vpow2.f32 %v1407_v33 }
0x137c   :  { %v1343_v15 = vpop.f32.mrf.mxu3 }
0x137d   :  { %v1344_v6 = vadd.f32 %v2023_v45, %v1343_v15 }
0x137e   :  { %v1553_v7 = vpop.eup %1552 }
0x137f   :  { %1355 = vst [vmem:[%s2115_s10 + $0x30] sm:$0xff] %v1344_v6  ;;  %1248 = vrot.lane.b32.xlu1 %v1553_v7, %s1563_s3 }
0x1380   :  { %v1555_v8 = vpop.eup %1554 }
0x1381   :  { %v1229_v9 = vadd.f32 1.0, %v1555_v8 }
0x1383   :  { %1556 = vrcp.f32 %v1229_v9  ;;  %v1241_v36 = vand.u32 2147483648, %v1229_v9  ;;  %vm1235_vm7 = vweird.f32 %v1229_v9  ;;  %v1239_v37 = vand.u32 2147483647, %v1229_v9 }
0x1385   :  { %v1242_v39 = vor.u32 1.1754944e-38, %v1241_v36  ;;  %vm1240_vm9 = vcmp.eq.f32.partialorder %v1239_v37, 8.507059e+37 }
0x1389   :  { %v1557_v12 = vpop.eup %1556 }
0x138a   :  { %v1231_v16 = vmul.f32 %v1557_v12, %v1229_v9  ;;  %vm1236_vm1 = vweird.f32 %v1557_v12 }
0x138b   :  { %vm1237_vm8 = vmor %vm1235_vm7, %vm1236_vm1 }
0x138c   :  { %v1232_v34 = vsub.f32 1.0, %v1231_v16 }
0x138e   :  { %v1233_v35 = vmul.f32 %v1557_v12, %v1232_v34 }
0x1390   :  { %v1234_v23 = vadd.f32 %v1557_v12, %v1233_v35 }
0x1392   :  { %v1238_v38 = vsel %vm1237_vm8, %v1557_v12, %v1234_v23 }
0x1393   :  { %v1243_v40 = vsel %vm1240_vm9, %v1242_v39, %v1238_v38 }
0x1394   :  { %v1246_v10 = vmul.f32 %v1243_v40, %v1124_v63 }
0x13f1   :  { %v1249_v43 = vpop.permute.xlu1 %1248 }
0x13f2   :  { %v1251_v41 = vmul.f32 %v1249_v43, %v1243_v40 }
0x13f4   :  { %1253 = vrot.lane.b32.xlu2 %v1251_v41, %s1564_s22 }
0x144e   :  { %v1254_v11 = vpop.permute.xlu2 %1253 }
0x144f   :  { %v1256_v13 = vadd.f32 %v1254_v11, %v1246_v10 }
0x1451   :  { %1558 = vtanh.f32 %v1256_v13 }
0x1457   :  { %v1559_v17 = vpop.eup %1558 }
0x1458   :  { %1259 = vrot.lane.b32.xlu0 %v1559_v17, %s1563_s3 }
0x14ca   :  { %v1260_v42 = vpop.permute.xlu0 %1259 }
0x14cb   :  { %v1262_v44 = vmul.f32 %v1260_v42, %v1243_v40 }
0x14cd   :  { %1264 = vrot.lane.b32.xlu1 %v1262_v44, %s1564_s22 }
0x153f   :  { %v1265_v46 = vpop.permute.xlu1 %1264 }
0x1540   :  { %1267 = vst.msk [vmem:[#allocation2 + $0x38] sm:$0xff] %vm209_vm6, %v1265_v46 }
0x1547   :  { %v1275_v47 = vld [vmem:[#allocation2 + $0x38] sm:$0xff] }
0x1548   :  { %1415 = vmatmul.msk.f32.gmra.mxu3 %vm209_vm6, %v1275_v47 }
0x15cb   :  { %v1346_v48 = vpop.f32.mrf.mxu3 }
0x15cc   :  { %v1347_v49 = vadd.f32 %v2023_v45, %v1346_v48 }
0x15ce   :  { %1356 = vst [vmem:[%s2115_s10 + $0x38] sm:$0xff] %v1347_v49 }

</bundles_post_ra>
